<compile_context>
chip_gen: v6e
topology: v6e:2x2x1
jax: 0.10.0
libtpu: 0.0.40
codegen_flags: <defaults>
</compile_context>

<pallas_src>
import functools

import jax
import jax.numpy as jnp
from jax import lax
from jax.experimental import pallas as pl
from jax.experimental.pallas import tpu as pltpu

PAD_IDX = 1  # self.padding_idx in the PyTorch module


def _hssa_embeddings_kernel(ids_flat_ref,   # SMEM (N*S,) int32 (scalar prefetch)
                            ids_blk_ref,    # VMEM (spb, S) int32
                            wtab_hbm,       # HBM  (V, H)  word table (pl.ANY)
                            ptab_ref,       # VMEM (Pu, H) sliced position table
                            ttab_ref,       # VMEM (T, H)  turn table
                            gamma_ref,      # VMEM (1, 1, H)
                            beta_ref,       # VMEM (1, 1, H)
                            out_ref,        # VMEM (spb, S, H)
                            gbuf_ref,       # VMEM scratch (2, spb, S, H)
                            dma_sems,       # DMA semaphores (2,)
                            *, spb, seq_len, max_dia_len, eps, pad_idx):
    S = seq_len
    H = out_ref.shape[-1]
    Pu = ptab_ref.shape[0]
    T = ttab_ref.shape[0]
    blk = pl.program_id(0)
    nblk = pl.num_programs(0)
    slot = blk % 2

    # ---- helper: issue per-token row gathers word_tab[id] (HBM) -> gbuf slot ---
    def issue_block_gathers(block_idx, slot_idx):
        base = block_idx * (spb * S)

        @pl.loop(0, spb)
        def _rows(s):
            row_base = base + s * S

            @pl.loop(0, S)
            def _cols(j):
                tok = ids_flat_ref[row_base + j]
                pltpu.make_async_copy(wtab_hbm.at[tok],
                                      gbuf_ref.at[slot_idx, s, j],
                                      dma_sems.at[slot_idx]).start()

    # ---- 1) prime: very first grid step issues its own gathers ---------------
    @pl.when(blk == 0)
    def _():
        issue_block_gathers(0, 0)

    # ---- 2) prefetch next block's word rows into the other slot --------------
    # These DMAs fly while we drain + combine + LayerNorm + write back this
    # block (and while Pallas prefetches the next ids block).
    @pl.when(blk + 1 < nblk)
    def _():
        issue_block_gathers(blk + 1, 1 - slot)

    # ---- 3) position ids: per-sequence cumsum of the pad mask ----------------
    # create_position_ids_from_input_ids: (cumsum(mask) * mask) + padding_idx
    ids = ids_blk_ref[...]                                   # (spb, S)
    mask = (ids != pad_idx).astype(jnp.float32)              # (spb, S)
    ki = lax.broadcasted_iota(jnp.int32, (S, S), 0)
    ji = lax.broadcasted_iota(jnp.int32, (S, S), 1)
    tri = (ki <= ji).astype(jnp.float32)                     # (S, S) lower-tri
    cum = jnp.dot(mask, tri, preferred_element_type=jnp.float32)
    pos_ids = (cum * mask).astype(jnp.int32) + pad_idx       # (spb, S)

    # ---- 4) position embeddings: one-hot contraction over Pu = S+2 rows ------
    p_oh = (lax.broadcasted_iota(jnp.int32, (spb, S, Pu), 2)
            == pos_ids[:, :, None]).astype(ptab_ref.dtype)   # (spb, S, Pu)
    pos_emb = jnp.einsum('bsp,ph->bsh', p_oh, ptab_ref[...],
                         preferred_element_type=jnp.float32)  # (spb, S, H)

    # ---- 5) turn embedding: one row per sequence, added at token index 1 -----
    seq_g = blk * spb + lax.broadcasted_iota(jnp.int32, (spb, 1), 0)
    turn = seq_g % max_dia_len                                # (spb, 1)
    t_oh = (lax.broadcasted_iota(jnp.int32, (spb, T), 1)
            == turn).astype(ttab_ref.dtype)                   # (spb, T)
    turn_emb = jnp.dot(t_oh, ttab_ref[...],
                       preferred_element_type=jnp.float32)    # (spb, H)
    tok1 = (lax.broadcasted_iota(jnp.int32, (S, 1), 0)
            == 1).astype(jnp.float32)                         # (S, 1)
    turn_add = turn_emb[:, None, :] * tok1[None, :, :]        # (spb, S, H)

    # ---- 6) drain this block's word-row gathers (issued last grid step) ------
    @pl.loop(0, spb)
    def _wait_rows(s):
        @pl.loop(0, S)
        def _wait_cols(j):
            pltpu.make_async_copy(wtab_hbm.at[0],
                                  gbuf_ref.at[slot, s, j],
                                  dma_sems.at[slot]).wait()

    # ---- 7) combine + LayerNorm over hidden -----------------------------------
    emb = gbuf_ref[slot].astype(jnp.float32) + pos_emb + turn_add
    mean = jnp.mean(emb, axis=-1, keepdims=True)
    xc = emb - mean
    var = jnp.mean(xc * xc, axis=-1, keepdims=True)
    inv = lax.rsqrt(var + eps)
    out = xc * inv * gamma_ref[...] + beta_ref[...]
    out_ref[...] = out.astype(out_ref.dtype)
    # TODO(synk): training-mode dropout (hidden_dropout_prob) is identity here.


def _pick_seq_per_block(N, S, target_rows=1024, max_rows=4096):
    """Pick seq_per_block: divides N, and is a multiple of 8 (or equals N)."""
    divs = [d for d in range(1, N + 1)
            if N % d == 0 and (d % 8 == 0 or d == N)]
    ok = [d for d in divs if d * S <= max_rows] or [min(divs)]
    for d in sorted(ok):
        if d * S >= target_rows:
            return d
    return max(ok)


def hssa_embeddings(input_ids, word_tab, pos_tab, turn_tab, gamma, beta,
                    *, max_dia_len, eps=1e-12, seq_per_block=None,
                    out_dtype=None):
    """Pallas implementation of HSSAEmbeddings.forward (input_ids path, eval)."""
    N, S = input_ids.shape
    V, H = word_tab.shape
    P = pos_tab.shape[0]
    T = turn_tab.shape[0]
    assert N % max_dia_len == 0, "batch must be B * max_dia_len"
    assert max_dia_len <= T, "max_dia_len exceeds turn-embedding table"
    # position ids range over [PAD_IDX, S + PAD_IDX]; they must be addressable.
    assert P >= S + PAD_IDX + 1, "max_position_embeddings too small for seq_len"
    # NOTE: token ids must lie in [0, V) (matches torch.nn.Embedding contract).

    if seq_per_block is None:
        seq_per_block = _pick_seq_per_block(N, S)
    spb = seq_per_block
    assert N % spb == 0 and (spb % 8 == 0 or spb == N), \
        "seq_per_block must divide N and be a multiple of 8 (or equal N)"
    out_dtype = word_tab.dtype if out_dtype is None else out_dtype

    Pu = S + PAD_IDX + 1
    pos_tab_u = pos_tab[:Pu]                      # only rows the kernel can hit

    ids_i32 = input_ids.astype(jnp.int32)
    ids_flat = ids_i32.reshape(N * S)             # SMEM scalar-prefetch copy
    gamma3 = gamma.reshape(1, 1, H).astype(jnp.float32)
    beta3 = beta.reshape(1, 1, H).astype(jnp.float32)

    kernel = functools.partial(
        _hssa_embeddings_kernel, spb=spb, seq_len=S, max_dia_len=max_dia_len,
        eps=eps, pad_idx=PAD_IDX)

    # explicit VMEM budget: double-buffered blocks + tables + 2-slot gather buf
    tab_bytes = jnp.dtype(word_tab.dtype).itemsize
    out_bytes = jnp.dtype(out_dtype).itemsize
    est = (2 * spb * S * 4
           + 2 * Pu * H * jnp.dtype(pos_tab_u.dtype).itemsize
           + 2 * T * H * jnp.dtype(turn_tab.dtype).itemsize
           + 4 * H * 4
           + 2 * spb * S * H * out_bytes
           + 2 * spb * S * H * tab_bytes)
    vmem_limit = int(min(100 << 20, max(32 << 20, 2 * est)))

    grid_spec = pltpu.PrefetchScalarGridSpec(
        num_scalar_prefetch=1,
        grid=(N // spb,),
        in_specs=[
            pl.BlockSpec((spb, S), lambda i, ids: (i, 0)),        # ids block
            pl.BlockSpec(memory_space=pl.ANY),                    # word table (HBM)
            pl.BlockSpec((Pu, H), lambda i, ids: (0, 0)),         # pos table slice
            pl.BlockSpec((T, H), lambda i, ids: (0, 0)),          # turn table
            pl.BlockSpec((1, 1, H), lambda i, ids: (0, 0, 0)),    # LN gamma
            pl.BlockSpec((1, 1, H), lambda i, ids: (0, 0, 0)),    # LN beta
        ],
        out_specs=pl.BlockSpec((spb, S, H), lambda i, ids: (i, 0, 0)),
        scratch_shapes=[
            pltpu.VMEM((2, spb, S, H), word_tab.dtype),           # 2-slot gather buf
            pltpu.SemaphoreType.DMA((2,)),                        # one sem per slot
        ],
    )

    return pl.pallas_call(
        kernel,
        out_shape=jax.ShapeDtypeStruct((N, S, H), out_dtype),
        grid_spec=grid_spec,
        compiler_params=pltpu.CompilerParams(
            # scratch (gather slots) carries state across grid steps -> serial
            dimension_semantics=("arbitrary",),
            vmem_limit_bytes=vmem_limit),
    )(ids_flat, ids_i32, word_tab, pos_tab_u, turn_tab, gamma3, beta3)


def hssa_embeddings_reference(input_ids, word_tab, pos_tab, turn_tab,
                              gamma, beta, *, max_dia_len, eps=1e-12):
    """Pure-JAX reference mirroring the PyTorch forward (eval mode)."""
    N, S = input_ids.shape
    H = word_tab.shape[1]
    mask = (input_ids != PAD_IDX).astype(jnp.int32)
    pos_ids = jnp.cumsum(mask, axis=1) * mask + PAD_IDX
    emb = word_tab[input_ids] + pos_tab[pos_ids]
    B = N // max_dia_len
    emb = emb.reshape(B, max_dia_len, S, H)
    turn_emb = turn_tab[jnp.arange(max_dia_len)][None, :, :]
    emb = emb.at[:, :, 1, :].add(turn_emb)
    emb = emb.reshape(N, S, H)
    mean = emb.mean(-1, keepdims=True)
    var = ((emb - mean) ** 2).mean(-1, keepdims=True)
    return (emb - mean) / jnp.sqrt(var + eps) * gamma + beta


if __name__ == "__main__":
    # Synthetic config: vocab=512, hidden=128 (lane-dense), max_pos=64, max_ut=8
    V, H, P, T = 512, 128, 64, 8
    B, L, S = 4, 4, 16          # L = max_dia_len, so N = B * L utterances
    N = B * L
    eps = 1e-12

    key = jax.random.PRNGKey(0)
    kw, kp, kt, kg, kb, ki = jax.random.split(key, 6)

    word_tab = (0.02 * jax.random.normal(kw, (V, H))).astype(jnp.float32)
    word_tab = word_tab.at[PAD_IDX].set(0.0)        # nn.Embedding padding_idx
    pos_tab = (0.02 * jax.random.normal(kp, (P, H))).astype(jnp.float32)
    pos_tab = pos_tab.at[PAD_IDX].set(0.0)
    turn_tab = (0.02 * jax.random.normal(kt, (T, H))).astype(jnp.float32)
    turn_tab = turn_tab.at[PAD_IDX].set(0.0)
    gamma = (1.0 + 0.1 * jax.random.normal(kg, (H,))).astype(jnp.float32)
    beta = (0.1 * jax.random.normal(kb, (H,))).astype(jnp.float32)

    input_ids = jax.random.randint(ki, (N, S), 0, V).astype(jnp.int32)
    input_ids = input_ids.at[::2, -5:].set(PAD_IDX)   # padded tails
    input_ids = input_ids.at[3, :].set(PAD_IDX)       # one fully-padded utterance

    out = hssa_embeddings(input_ids, word_tab, pos_tab, turn_tab, gamma, beta,
                          max_dia_len=L, eps=eps, seq_per_block=8)
    out = jax.block_until_ready(out)

    ref = hssa_embeddings_reference(input_ids, word_tab, pos_tab, turn_tab,
                                    gamma, beta, max_dia_len=L, eps=eps)
    assert out.shape == (N, S, H), out.shape
    max_err = float(jnp.max(jnp.abs(out - ref)))
    assert max_err < 1e-4, f"max abs error {max_err}"
    print("KERNEL_OK")
</pallas_src>

<mosaic_0001>
module attributes {stable_mosaic.version = 11 : i64} {
  func.func @_hssa_embeddings_kernel(%arg0: i32, %arg1: memref<256xi32, #tpu.memory_space<smem>>, %arg2: memref<8x16xi32, #tpu.memory_space<vmem>>, %arg3: memref<512x128xf32, #tpu.memory_space<any>>, %arg4: memref<18x128xf32, #tpu.memory_space<vmem>>, %arg5: memref<8x128xf32, #tpu.memory_space<vmem>>, %arg6: memref<1x1x128xf32, #tpu.memory_space<vmem>>, %arg7: memref<1x1x128xf32, #tpu.memory_space<vmem>>, %arg8: memref<8x16x128xf32, #tpu.memory_space<vmem>>, %arg9: memref<2x8x16x128xf32, #tpu.memory_space<vmem>>, %arg10: memref<2x!tpu.dma_semaphore, #tpu.memory_space<semaphore_mem>>) attributes {dimension_semantics = [#tpu.dimension_semantics<arbitrary>], iteration_bounds = array<i64: 2>, scalar_prefetch = 1 : i64, scratch_operands = 2 : i64, tpu.core_type = #tpu.core_type<tc>, window_params = [{transform_indices = @transform_0, window_bounds = array<i64: 8, 16>}, {}, {pipeline_mode = #tpu.pipeline_mode<synchronous>, transform_indices = @transform_2, window_bounds = array<i64: 18, 128>}, {pipeline_mode = #tpu.pipeline_mode<synchronous>, transform_indices = @transform_3, window_bounds = array<i64: 8, 128>}, {pipeline_mode = #tpu.pipeline_mode<synchronous>, transform_indices = @transform_4, window_bounds = array<i64: 1, 1, 128>}, {pipeline_mode = #tpu.pipeline_mode<synchronous>, transform_indices = @transform_5, window_bounds = array<i64: 1, 1, 128>}, {transform_indices = @transform_6, window_bounds = array<i64: 8, 16, 128>}]} {
    %c2_i32 = arith.constant 2 : i32
    %c0_i32 = arith.constant 0 : i32
    %0 = arith.cmpi eq, %c2_i32, %c0_i32 : i32
    %c1_i32 = arith.constant 1 : i32
    %1 = arith.select %0, %c1_i32, %c2_i32 : i32
    %2 = arith.remsi %arg0, %1 : i32
    %c0_i32_0 = arith.constant 0 : i32
    %3 = arith.cmpi ne, %2, %c0_i32_0 : i32
    %c0_i32_1 = arith.constant 0 : i32
    %4 = arith.cmpi slt, %2, %c0_i32_1 : i32
    %c0_i32_2 = arith.constant 0 : i32
    %5 = arith.cmpi slt, %1, %c0_i32_2 : i32
    %6 = arith.xori %4, %5 : i1
    %7 = arith.andi %6, %3 : i1
    %8 = arith.addi %2, %1 : i32
    %9 = arith.select %7, %8, %2 : i32
    %c0_i32_3 = arith.constant 0 : i32
    %10 = arith.cmpi eq, %arg0, %c0_i32_3 : i32
    %11 = arith.extui %10 : i1 to i32
    %c0_i32_4 = arith.constant 0 : i32
    %12 = arith.cmpi ne, %11, %c0_i32_4 : i32
    scf.if %12 {
      %c0_i32_44 = arith.constant 0 : i32
      %c8_i32_45 = arith.constant 8 : i32
      %106 = arith.addi %c0_i32_44, %c8_i32_45 : i32
      %c1_i32_46 = arith.constant 1 : i32
      scf.for %arg11 = %c0_i32_44 to %106 step %c1_i32_46  : i32 {
        %c1_i32_48 = arith.constant 1 : i32
        %107 = arith.muli %arg11, %c1_i32_48 : i32
        %c0_i32_49 = arith.constant 0 : i32
        %108 = arith.addi %c0_i32_49, %107 : i32
        %c16_i32 = arith.constant 16 : i32
        %109 = arith.muli %108, %c16_i32 : i32
        %c0_i32_50 = arith.constant 0 : i32
        %110 = arith.addi %c0_i32_50, %109 : i32
        %c0_i32_51 = arith.constant 0 : i32
        %c16_i32_52 = arith.constant 16 : i32
        %111 = arith.addi %c0_i32_51, %c16_i32_52 : i32
        %c1_i32_53 = arith.constant 1 : i32
        scf.for %arg12 = %c0_i32_51 to %111 step %c1_i32_53  : i32 {
          %c1_i32_55 = arith.constant 1 : i32
          %112 = arith.muli %arg12, %c1_i32_55 : i32
          %c0_i32_56 = arith.constant 0 : i32
          %113 = arith.addi %c0_i32_56, %112 : i32
          %114 = arith.addi %110, %113 : i32
          %115 = arith.index_cast %114 : i32 to index
          %116 = memref.load %arg1[%115] : memref<256xi32, #tpu.memory_space<smem>>
          %c0_i32_57 = arith.constant 0 : i32
          %c0_i32_58 = arith.constant 0 : i32
          %c0_i32_59 = arith.constant 0 : i32
          %117 = tpu.memref_slice %arg3[%116, %c0_i32_59] : memref<512x128xf32, #tpu.memory_space<any>> -> memref<1x128xf32, #tpu.memory_space<any>>
          %118 = tpu.memref_squeeze %117 : memref<1x128xf32, #tpu.memory_space<any>> -> memref<128xf32, #tpu.memory_space<any>>
          %c0_i32_60 = arith.constant 0 : i32
          %119 = tpu.memref_slice %arg9[%c0_i32_57, %108, %113, %c0_i32_60] : memref<2x8x16x128xf32, #tpu.memory_space<vmem>> -> memref<1x1x1x128xf32, #tpu.memory_space<vmem>>
          %120 = tpu.memref_squeeze %119 : memref<1x1x1x128xf32, #tpu.memory_space<vmem>> -> memref<128xf32, #tpu.memory_space<vmem>>
          %121 = tpu.memref_slice %arg10[%c0_i32_58] : memref<2x!tpu.dma_semaphore, #tpu.memory_space<semaphore_mem>> -> memref<1x!tpu.dma_semaphore, #tpu.memory_space<semaphore_mem>>
          %122 = tpu.memref_squeeze %121 : memref<1x!tpu.dma_semaphore, #tpu.memory_space<semaphore_mem>> -> memref<!tpu.dma_semaphore, #tpu.memory_space<semaphore_mem>>
          tpu.enqueue_dma source(%118 : memref<128xf32, #tpu.memory_space<any>>) target(%120 : memref<128xf32, #tpu.memory_space<vmem>>) target_semaphore(%122 : memref<!tpu.dma_semaphore, #tpu.memory_space<semaphore_mem>>)
        }
        %c16_i32_54 = arith.constant 16 : i32
      }
      %c8_i32_47 = arith.constant 8 : i32
    } else {
    }
    %c1_i32_5 = arith.constant 1 : i32
    %13 = arith.addi %arg0, %c1_i32_5 : i32
    %c2_i32_6 = arith.constant 2 : i32
    %14 = arith.cmpi slt, %13, %c2_i32_6 : i32
    %15 = arith.extui %14 : i1 to i32
    %c0_i32_7 = arith.constant 0 : i32
    %16 = arith.cmpi ne, %15, %c0_i32_7 : i32
    scf.if %16 {
      %c1_i32_44 = arith.constant 1 : i32
      %106 = arith.addi %arg0, %c1_i32_44 : i32
      %c1_i32_45 = arith.constant 1 : i32
      %107 = arith.subi %c1_i32_45, %9 : i32
      %c128_i32 = arith.constant 128 : i32
      %108 = arith.muli %106, %c128_i32 : i32
      %c0_i32_46 = arith.constant 0 : i32
      %c8_i32_47 = arith.constant 8 : i32
      %109 = arith.addi %c0_i32_46, %c8_i32_47 : i32
      %c1_i32_48 = arith.constant 1 : i32
      scf.for %arg11 = %c0_i32_46 to %109 step %c1_i32_48  : i32 {
        %c1_i32_50 = arith.constant 1 : i32
        %110 = arith.muli %arg11, %c1_i32_50 : i32
        %c0_i32_51 = arith.constant 0 : i32
        %111 = arith.addi %c0_i32_51, %110 : i32
        %c16_i32 = arith.constant 16 : i32
        %112 = arith.muli %111, %c16_i32 : i32
        %113 = arith.addi %108, %112 : i32
        %c0_i32_52 = arith.constant 0 : i32
        %c16_i32_53 = arith.constant 16 : i32
        %114 = arith.addi %c0_i32_52, %c16_i32_53 : i32
        %c1_i32_54 = arith.constant 1 : i32
        scf.for %arg12 = %c0_i32_52 to %114 step %c1_i32_54  : i32 {
          %c1_i32_56 = arith.constant 1 : i32
          %115 = arith.muli %arg12, %c1_i32_56 : i32
          %c0_i32_57 = arith.constant 0 : i32
          %116 = arith.addi %c0_i32_57, %115 : i32
          %117 = arith.addi %113, %116 : i32
          %118 = arith.index_cast %117 : i32 to index
          %119 = memref.load %arg1[%118] : memref<256xi32, #tpu.memory_space<smem>>
          %c0_i32_58 = arith.constant 0 : i32
          %120 = tpu.memref_slice %arg3[%119, %c0_i32_58] : memref<512x128xf32, #tpu.memory_space<any>> -> memref<1x128xf32, #tpu.memory_space<any>>
          %121 = tpu.memref_squeeze %120 : memref<1x128xf32, #tpu.memory_space<any>> -> memref<128xf32, #tpu.memory_space<any>>
          %c0_i32_59 = arith.constant 0 : i32
          %122 = tpu.memref_slice %arg9[%107, %111, %116, %c0_i32_59] : memref<2x8x16x128xf32, #tpu.memory_space<vmem>> -> memref<1x1x1x128xf32, #tpu.memory_space<vmem>>
          %123 = tpu.memref_squeeze %122 : memref<1x1x1x128xf32, #tpu.memory_space<vmem>> -> memref<128xf32, #tpu.memory_space<vmem>>
          %124 = tpu.memref_slice %arg10[%107] : memref<2x!tpu.dma_semaphore, #tpu.memory_space<semaphore_mem>> -> memref<1x!tpu.dma_semaphore, #tpu.memory_space<semaphore_mem>>
          %125 = tpu.memref_squeeze %124 : memref<1x!tpu.dma_semaphore, #tpu.memory_space<semaphore_mem>> -> memref<!tpu.dma_semaphore, #tpu.memory_space<semaphore_mem>>
          tpu.enqueue_dma source(%121 : memref<128xf32, #tpu.memory_space<any>>) target(%123 : memref<128xf32, #tpu.memory_space<vmem>>) target_semaphore(%125 : memref<!tpu.dma_semaphore, #tpu.memory_space<semaphore_mem>>)
        }
        %c16_i32_55 = arith.constant 16 : i32
      }
      %c8_i32_49 = arith.constant 8 : i32
    } else {
    }
    %c0 = arith.constant 0 : index
    %c0_8 = arith.constant 0 : index
    %17 = vector.load %arg2[%c0, %c0_8] : memref<8x16xi32, #tpu.memory_space<vmem>>, vector<8x16xi32>
    %c1_i32_9 = arith.constant 1 : i32
    %18 = vector.broadcast %c1_i32_9 : i32 to vector<8x16xi32>
    %19 = arith.cmpi ne, %17, %18 : vector<8x16xi32>
    %20 = arith.extui %19 : vector<8x16xi1> to vector<8x16xi32>
    %21 = arith.sitofp %20 : vector<8x16xi32> to vector<8x16xf32>
    %22 = tpu.iota {dimensions = array<i32: 0>} : vector<16x16xi32>
    %23 = tpu.iota {dimensions = array<i32: 1>} : vector<16x16xi32>
    %24 = arith.cmpi sle, %22, %23 : vector<16x16xi32>
    %25 = arith.extui %24 : vector<16x16xi1> to vector<16x16xi32>
    %26 = arith.sitofp %25 : vector<16x16xi32> to vector<16x16xf32>
    %cst = arith.constant dense<0.000000e+00> : vector<8x16xf32>
    %27 = tpu.matmul %21, %26, %cst {dimension_numbers = #tpu.dot_dimension_numbers<[1], [0], [0], [1], [0, 0, 1, 1], [], []>} : vector<8x16xf32>, vector<16x16xf32>, vector<8x16xf32> -> vector<8x16xf32>
    %28 = arith.mulf %27, %21 : vector<8x16xf32>
    %29 = arith.fptosi %28 : vector<8x16xf32> to vector<8x16xi32>
    %c1_i32_10 = arith.constant 1 : i32
    %30 = vector.broadcast %c1_i32_10 : i32 to vector<8x16xi32>
    %31 = arith.addi %29, %30 : vector<8x16xi32>
    %32 = tpu.iota {dimensions = array<i32: 2>} : vector<8x16x18xi32>
    %33 = vector.shape_cast %31 : vector<8x16xi32> to vector<8x16x1xi32>
    %34 = vector.broadcast %33 : vector<8x16x1xi32> to vector<8x16x18xi32>
    %35 = arith.cmpi eq, %32, %34 : vector<8x16x18xi32>
    %36 = arith.extui %35 : vector<8x16x18xi1> to vector<8x16x18xi32>
    %37 = arith.sitofp %36 : vector<8x16x18xi32> to vector<8x16x18xf32>
    %c0_11 = arith.constant 0 : index
    %c0_12 = arith.constant 0 : index
    %38 = vector.load %arg4[%c0_11, %c0_12] : memref<18x128xf32, #tpu.memory_space<vmem>>, vector<18x128xf32>
    "tpu.trace_start"() <{level = 10 : i32, message = "bsp,ph->bsh"}> : () -> ()
    %cst_13 = arith.constant dense<0.000000e+00> : vector<8x16x128xf32>
    %39 = tpu.matmul %37, %38, %cst_13 {dimension_numbers = #tpu.dot_dimension_numbers<[2], [0], [0, 1], [1], [0, 0, 0, 1, 1, 1], [], []>} : vector<8x16x18xf32>, vector<18x128xf32>, vector<8x16x128xf32> -> vector<8x16x128xf32>
    "tpu.trace_stop"() : () -> ()
    %c8_i32 = arith.constant 8 : i32
    %40 = arith.muli %arg0, %c8_i32 : i32
    %41 = tpu.iota {dimensions = array<i32: 0>} : vector<8x1xi32>
    %42 = vector.broadcast %40 : i32 to vector<8x1xi32>
    %43 = arith.addi %42, %41 : vector<8x1xi32>
    %c4_i32 = arith.constant 4 : i32
    %c0_i32_14 = arith.constant 0 : i32
    %44 = arith.cmpi eq, %c4_i32, %c0_i32_14 : i32
    %c1_i32_15 = arith.constant 1 : i32
    %45 = arith.select %44, %c1_i32_15, %c4_i32 : i32
    %46 = vector.broadcast %45 : i32 to vector<8x1xi32>
    %47 = arith.remsi %43, %46 : vector<8x1xi32>
    %c0_i32_16 = arith.constant 0 : i32
    %48 = vector.broadcast %c0_i32_16 : i32 to vector<8x1xi32>
    %49 = arith.cmpi ne, %47, %48 : vector<8x1xi32>
    %c0_i32_17 = arith.constant 0 : i32
    %50 = vector.broadcast %c0_i32_17 : i32 to vector<8x1xi32>
    %51 = arith.cmpi slt, %47, %50 : vector<8x1xi32>
    %c0_i32_18 = arith.constant 0 : i32
    %52 = arith.cmpi slt, %45, %c0_i32_18 : i32
    %53 = vector.broadcast %52 : i1 to vector<8x1xi1>
    %54 = vector.broadcast %53 : vector<8x1xi1> to vector<8x1xi1>
    %55 = arith.xori %51, %54 : vector<8x1xi1>
    %56 = arith.andi %55, %49 : vector<8x1xi1>
    %57 = vector.broadcast %45 : i32 to vector<8x1xi32>
    %58 = arith.addi %47, %57 : vector<8x1xi32>
    %59 = arith.select %56, %58, %47 : vector<8x1xi1>, vector<8x1xi32>
    %60 = tpu.iota {dimensions = array<i32: 1>} : vector<8x8xi32>
    %61 = vector.broadcast %59 : vector<8x1xi32> to vector<8x8xi32>
    %62 = arith.cmpi eq, %60, %61 : vector<8x8xi32>
    %63 = arith.extui %62 : vector<8x8xi1> to vector<8x8xi32>
    %64 = arith.sitofp %63 : vector<8x8xi32> to vector<8x8xf32>
    %c0_19 = arith.constant 0 : index
    %c0_20 = arith.constant 0 : index
    %65 = vector.load %arg5[%c0_19, %c0_20] : memref<8x128xf32, #tpu.memory_space<vmem>>, vector<8x128xf32>
    %cst_21 = arith.constant dense<0.000000e+00> : vector<8x128xf32>
    %66 = tpu.matmul %64, %65, %cst_21 {dimension_numbers = #tpu.dot_dimension_numbers<[1], [0], [0], [1], [0, 0, 1, 1], [], []>} : vector<8x8xf32>, vector<8x128xf32>, vector<8x128xf32> -> vector<8x128xf32>
    %67 = tpu.iota {dimensions = array<i32: 0>} : vector<16x1xi32>
    %c1_i32_22 = arith.constant 1 : i32
    %68 = vector.broadcast %c1_i32_22 : i32 to vector<16x1xi32>
    %69 = arith.cmpi eq, %67, %68 : vector<16x1xi32>
    %70 = arith.extui %69 : vector<16x1xi1> to vector<16x1xi32>
    %71 = arith.sitofp %70 : vector<16x1xi32> to vector<16x1xf32>
    %72 = vector.shape_cast %66 : vector<8x128xf32> to vector<8x1x128xf32>
    %73 = vector.shape_cast %71 : vector<16x1xf32> to vector<1x16x1xf32>
    %74 = vector.broadcast %72 : vector<8x1x128xf32> to vector<8x16x128xf32>
    %75 = vector.broadcast %73 : vector<1x16x1xf32> to vector<8x16x128xf32>
    %76 = arith.mulf %74, %75 : vector<8x16x128xf32>
    %c0_i32_23 = arith.constant 0 : i32
    %c8_i32_24 = arith.constant 8 : i32
    %77 = arith.addi %c0_i32_23, %c8_i32_24 : i32
    %c1_i32_25 = arith.constant 1 : i32
    scf.for %arg11 = %c0_i32_23 to %77 step %c1_i32_25  : i32 {
      %c1_i32_44 = arith.constant 1 : i32
      %106 = arith.muli %arg11, %c1_i32_44 : i32
      %c0_i32_45 = arith.constant 0 : i32
      %107 = arith.addi %c0_i32_45, %106 : i32
      %c0_i32_46 = arith.constant 0 : i32
      %c16_i32 = arith.constant 16 : i32
      %108 = arith.addi %c0_i32_46, %c16_i32 : i32
      %c1_i32_47 = arith.constant 1 : i32
      scf.for %arg12 = %c0_i32_46 to %108 step %c1_i32_47  : i32 {
        %c1_i32_49 = arith.constant 1 : i32
        %109 = arith.muli %arg12, %c1_i32_49 : i32
        %c0_i32_50 = arith.constant 0 : i32
        %110 = arith.addi %c0_i32_50, %109 : i32
        %c0_i32_51 = arith.constant 0 : i32
        %c0_i32_52 = arith.constant 0 : i32
        %111 = tpu.memref_slice %arg3[%c0_i32_51, %c0_i32_52] : memref<512x128xf32, #tpu.memory_space<any>> -> memref<1x128xf32, #tpu.memory_space<any>>
        %112 = tpu.memref_squeeze %111 : memref<1x128xf32, #tpu.memory_space<any>> -> memref<128xf32, #tpu.memory_space<any>>
        %c0_i32_53 = arith.constant 0 : i32
        %113 = tpu.memref_slice %arg9[%9, %107, %110, %c0_i32_53] : memref<2x8x16x128xf32, #tpu.memory_space<vmem>> -> memref<1x1x1x128xf32, #tpu.memory_space<vmem>>
        %114 = tpu.memref_squeeze %113 : memref<1x1x1x128xf32, #tpu.memory_space<vmem>> -> memref<128xf32, #tpu.memory_space<vmem>>
        %115 = tpu.memref_slice %arg10[%9] : memref<2x!tpu.dma_semaphore, #tpu.memory_space<semaphore_mem>> -> memref<1x!tpu.dma_semaphore, #tpu.memory_space<semaphore_mem>>
        %116 = tpu.memref_squeeze %115 : memref<1x!tpu.dma_semaphore, #tpu.memory_space<semaphore_mem>> -> memref<!tpu.dma_semaphore, #tpu.memory_space<semaphore_mem>>
        tpu.wait_dma2 semaphore(%116 : memref<!tpu.dma_semaphore, #tpu.memory_space<semaphore_mem>>) src(%112 : memref<128xf32, #tpu.memory_space<any>>) dst(%114 : memref<128xf32, #tpu.memory_space<vmem>>)
      }
      %c16_i32_48 = arith.constant 16 : i32
    }
    %c8_i32_26 = arith.constant 8 : i32
    %78 = arith.index_cast %9 : i32 to index
    %c0_27 = arith.constant 0 : index
    %c0_28 = arith.constant 0 : index
    %c0_29 = arith.constant 0 : index
    %79 = vector.load %arg9[%78, %c0_27, %c0_28, %c0_29] : memref<2x8x16x128xf32, #tpu.memory_space<vmem>>, vector<1x8x16x128xf32>
    %80 = vector.shape_cast %79 : vector<1x8x16x128xf32> to vector<8x16x128xf32>
    %81 = arith.addf %80, %39 : vector<8x16x128xf32>
    %82 = arith.addf %81, %76 : vector<8x16x128xf32>
    %cst_30 = arith.constant dense<0.000000e+00> : vector<8x16xf32>
    %83 = vector.multi_reduction <add>, %82, %cst_30 [2] : vector<8x16x128xf32> to vector<8x16xf32>
    %84 = vector.shape_cast %83 : vector<8x16xf32> to vector<8x16x1xf32>
    %cst_31 = arith.constant 1.280000e+02 : f32
    %85 = vector.broadcast %cst_31 : f32 to vector<8x16x1xf32>
    %86 = arith.divf %84, %85 : vector<8x16x1xf32>
    %87 = vector.broadcast %86 : vector<8x16x1xf32> to vector<8x16x128xf32>
    %88 = arith.subf %82, %87 : vector<8x16x128xf32>
    %89 = arith.mulf %88, %88 : vector<8x16x128xf32>
    %cst_32 = arith.constant dense<0.000000e+00> : vector<8x16xf32>
    %90 = vector.multi_reduction <add>, %89, %cst_32 [2] : vector<8x16x128xf32> to vector<8x16xf32>
    %91 = vector.shape_cast %90 : vector<8x16xf32> to vector<8x16x1xf32>
    %cst_33 = arith.constant 1.280000e+02 : f32
    %92 = vector.broadcast %cst_33 : f32 to vector<8x16x1xf32>
    %93 = arith.divf %91, %92 : vector<8x16x1xf32>
    %cst_34 = arith.constant 9.99999996E-13 : f32
    %94 = vector.broadcast %cst_34 : f32 to vector<8x16x1xf32>
    %95 = arith.addf %93, %94 : vector<8x16x1xf32>
    %96 = math.rsqrt %95 : vector<8x16x1xf32>
    %97 = vector.broadcast %96 : vector<8x16x1xf32> to vector<8x16x128xf32>
    %98 = arith.mulf %88, %97 : vector<8x16x128xf32>
    %c0_35 = arith.constant 0 : index
    %c0_36 = arith.constant 0 : index
    %c0_37 = arith.constant 0 : index
    %99 = vector.load %arg6[%c0_35, %c0_36, %c0_37] : memref<1x1x128xf32, #tpu.memory_space<vmem>>, vector<1x1x128xf32>
    %100 = vector.broadcast %99 : vector<1x1x128xf32> to vector<8x16x128xf32>
    %101 = arith.mulf %98, %100 : vector<8x16x128xf32>
    %c0_38 = arith.constant 0 : index
    %c0_39 = arith.constant 0 : index
    %c0_40 = arith.constant 0 : index
    %102 = vector.load %arg7[%c0_38, %c0_39, %c0_40] : memref<1x1x128xf32, #tpu.memory_space<vmem>>, vector<1x1x128xf32>
    %103 = vector.broadcast %102 : vector<1x1x128xf32> to vector<8x16x128xf32>
    %104 = arith.addf %101, %103 : vector<8x16x128xf32>
    %c0_41 = arith.constant 0 : index
    %c0_42 = arith.constant 0 : index
    %c0_43 = arith.constant 0 : index
    %105 = vector.load %arg8[%c0_41, %c0_42, %c0_43] : memref<8x16x128xf32, #tpu.memory_space<vmem>>, vector<8x16x128xf32>
    tpu.vector_store %arg8[%c0_41, %c0_42, %c0_43], %104 {strides = array<i32>} : memref<8x16x128xf32, #tpu.memory_space<vmem>>, vector<8x16x128xf32>,
    return
  }
  func.func @transform_0(%arg0: i32, %arg1: memref<256xi32, #tpu.memory_space<smem>>) -> (i32, i32) {
    %c0_i32 = arith.constant 0 : i32
    %c0_i32_0 = arith.constant 0 : i32
    return %arg0, %c0_i32 : i32, i32
  }
  func.func @transform_2(%arg0: i32, %arg1: memref<256xi32, #tpu.memory_space<smem>>) -> (i32, i32) {
    %c0_i32 = arith.constant 0 : i32
    %c0_i32_0 = arith.constant 0 : i32
    %c0_i32_1 = arith.constant 0 : i32
    return %c0_i32, %c0_i32_0 : i32, i32
  }
  func.func @transform_3(%arg0: i32, %arg1: memref<256xi32, #tpu.memory_space<smem>>) -> (i32, i32) {
    %c0_i32 = arith.constant 0 : i32
    %c0_i32_0 = arith.constant 0 : i32
    %c0_i32_1 = arith.constant 0 : i32
    return %c0_i32, %c0_i32_0 : i32, i32
  }
  func.func @transform_4(%arg0: i32, %arg1: memref<256xi32, #tpu.memory_space<smem>>) -> (i32, i32, i32) {
    %c0_i32 = arith.constant 0 : i32
    %c0_i32_0 = arith.constant 0 : i32
    %c0_i32_1 = arith.constant 0 : i32
    %c0_i32_2 = arith.constant 0 : i32
    return %c0_i32, %c0_i32_0, %c0_i32_1 : i32, i32, i32
  }
  func.func @transform_5(%arg0: i32, %arg1: memref<256xi32, #tpu.memory_space<smem>>) -> (i32, i32, i32) {
    %c0_i32 = arith.constant 0 : i32
    %c0_i32_0 = arith.constant 0 : i32
    %c0_i32_1 = arith.constant 0 : i32
    %c0_i32_2 = arith.constant 0 : i32
    return %c0_i32, %c0_i32_0, %c0_i32_1 : i32, i32, i32
  }
  func.func @transform_6(%arg0: i32, %arg1: memref<256xi32, #tpu.memory_space<smem>>) -> (i32, i32, i32) {
    %c0_i32 = arith.constant 0 : i32
    %c0_i32_0 = arith.constant 0 : i32
    %c0_i32_1 = arith.constant 0 : i32
    return %arg0, %c0_i32, %c0_i32_0 : i32, i32, i32
  }
}

</mosaic_0001>

<bundles_post_ra>
// kernel: tpu_custom_call.1
= control target key start
LH: loop header
LB: loop body
LE: loop exit
PB: predicated region body
PF: predicated region fallthrough
CT: control target
= control target key end

     0   :  { %s2031_s24 = smov [#allocation5]   ;;  %s2730_s0 = inlined_call_operand.hbm [shape: s32[256], index: 0, kind: input, shape index: {}]   ;;  %s2731_s1 = inlined_call_operand.hbm [shape: s32[16,16], index: 1, kind: input, shape index: {}]   ;;  %s2732_s2 = inlined_call_operand.hbm [shape: f32[512,128], index: 2, kind: input, shape index: {}]   ;;  %s2733_s3 = inlined_call_operand.hbm [shape: f32[18,128], index: 3, kind: input, shape index: {}]   ;;  %s2734_s4 = inlined_call_operand.hbm [shape: f32[8,128], index: 4, kind: input, shape index: {}]   ;;  %s2735_s5 = inlined_call_operand.vmem [shape: f32[1,1,128], index: 5, kind: input, shape index: {}]   ;;  %s2736_s6 = inlined_call_operand.vmem [shape: f32[1,1,128], index: 6, kind: input, shape index: {}]   ;;  %s2737_s7 = inlined_call_operand.hbm [shape: f32[16,16,128], index: 7, kind: output, shape index: {}]  }
   0x1   :  { %2750 = sst [smem:[#allocation33_spill]] %s2731_s1 }
   0x2   :  { %2751 = sst [smem:[#allocation34_spill]] %s2733_s3 }
   0x3   :  { %2752 = sst [smem:[#allocation35_spill]] %s2734_s4 }
   0x4   :  { %13 = dma.hbm_to_smem %s2730_s0, 32, %s2031_s24, [#allocation4] }
   0x5   :  { %1975 = dma.done.wait [#allocation4], 32 }
   0x6   :  { %1976 = vsyncadd [#allocation4], 4294967264 }
   0x7   :  { %15 = sfence }
   0x8   :  { %16 = vsyncpa [#allocation7], 0 }
   0x9   :  { %18 = vsyncpa [#allocation7 + $0x1], 0 }
   0xa   :  { %19 = vsyncpa [#allocation10], 0 }
   0xb   :  { %20 = vsyncpa [#allocation8], 0 }
   0xc   :  { %22 = vsyncpa [#allocation8 + $0x1], 0  ;;  %s2089_s27 = smov 0   ;;  %s2091_s28 = smov 0  }
   0xd   :  { %s2093_s29 = smov 0   ;;  %s2095_s30 = smov 0  }
   0xe LB: > { %2753 = sst [smem:[#allocation24_spill]] %s1993_s27  ;;  %s2110_s0 = sadd.s32 4294967295, %s2005_s30   ;;  %s2005_s30 = sphi %s2095_s30, %s2788_s30   ;;  %s2001_s29 = sphi %s2093_s29, %s2791_s29   ;;  %s1997_s28 = sphi %s2091_s28, %s2790_s28   ;;  %s1993_s27 = sphi %s2089_s27, %s2789_s27  }
   0xf   : > { %2754 = sst [smem:[#allocation25_spill]] %s1997_s28  ;;  %s1465_s8 = sadd.s32 4294967294, %s2005_s30  }
  0x10   : > { %2755 = sst [smem:[#allocation26_spill]] %s2001_s29  ;;  %p48_p0 = scmp.ne.s32.totalorder %s1997_s28, %s1993_s27 }
  0x11   : > { %2756 = sst [smem:[#allocation27_spill]] %s2005_s30  ;;  %p2738_p1 = scmp.eq.s32.totalorder %s2110_s0, 0 }
  0x12   : > { %p162_p3 = scmp.eq.s32.totalorder %s1465_s8, 1  ;;  %p1466_p5 = scmp.ge.s32.totalorder %s2005_s30, 1 }
  0x13   : > { %p2119_p4 = por %p2738_p1, %p48_p0  ;;  %p169_p7 = scmp.lt.s32.totalorder %s2005_s30, 3 }
  0x14   : > { %p2124_p6 = por %p162_p3, %p48_p0  ;;  %s2032_s12 = smov [#allocation9]  }
  0x15   : > { %s2757_s9 = scalar_select %p2119_p4, 1, 0 }
  0x16   : > { %s2758_s10 = scalar_select %p2124_p6, 1, 0 }
  0x17   : > { %p2130_p9 = pnand %p1466_p5, %p169_p7  ;;  %s181_s13 = sshll.u32 %s2032_s12, 4  ;;  %s182_s13 = int_to_ptr.vmem [resolvable:$true] %s181_s13 }
  0x18   : > { %2759 = sst [smem:[#allocation28_spill]] %s2758_s10  ;;  %s2033_s15 = smov [#allocation11]  }
  0x19   : > { %s2760_s11 = scalar_select %p2130_p9, 1, 0 }
  0x1a   : > { %p1633_p10 = pneg %p2130_p9  ;;  %s195_s16 = sshll.u32 %s2033_s15, 4  ;;  %s196_s16 = int_to_ptr.vmem [resolvable:$true] %s195_s16 }
  0x1b   : > { %s1796_s17 = scalar_lea.vmem %s182_s13, 384  ;;  %p1804_p7 = scmp.lt.s32.totalorder %s182_s13, %s182_s13 }
  0x1c   : > { %p2139_p12 = pnand %p1633_p10, %p2738_p1  ;;  %p1797_p0 = scmp.ne.s32.totalorder %s182_s13, %s1796_s17 }
  0x1d   : > { %p1805_p11 = scmp.lt.s32.totalorder %s1796_s17, %s1796_s17 }
  0x1e   : > { %p1787_p13 = pneg %p2139_p12 }
  0x1f   : > { %p1806_p8 = por %p1805_p11, %p1804_p7 }
  0x20   : > { %p1799_p3 = pnand %p1797_p0, %p1787_p13 }
  0x22   : > { %p1800_p5 = pneg %p1799_p3 }
  0x24   : > { %p1807_p10 = pnand %p1806_p8, %p1800_p5 }
  0x26   : > { %1810 = shalt.err (!%p1807_p10)
}
  0x27   : > { %s2034_s18 = smov 128   ;;  %s2035_s19 = smov 8  }
  0x28   : > { %s2762_s3 = sld [smem:[#allocation34_spill]]  ;;  %s1822_s22 = scalar_lea.vmem %s196_s16, 128 }
  0x29   : > { %p1823_p1 = scmp.ne.s32.totalorder %s196_s16, %s1822_s22  ;;  %p1830_p2 = scmp.lt.s32.totalorder %s196_s16, %s196_s16 }
  0x2a   : > { %p1831_p6 = scmp.lt.s32.totalorder %s1822_s22, %s1822_s22 }
  0x2b   : > { %p1825_p0 = pnand %p1823_p1, %p1787_p13 }
  0x2c   : > { %p1832_p11 = por %p1831_p6, %p1830_p2 }
  0x2d   : > { %p1826_p3 = pneg %p1825_p0 }
  0x2e   : > { %1636 = dma.hbm_to_vmem [thread:$0]  (!%p2139_p12), %s2762_s3, 384, %s182_s13, [#allocation10], %s2034_s18, %s2034_s18, %s2035_s19  }
  0x2f   : > { %p1833_p8 = pnand %p1832_p11, %p1826_p3 }
  0x31   : > { %1836 = shalt.err (!%p1833_p8)
}
  0x32   : > { %s2763_s4 = sld [smem:[#allocation35_spill]]  ;;  %s2162_s25 = sadd.s32 1, %s2005_s30  }
  0x33   : > { %2764 = sst [smem:[#allocation29_spill]] %s2162_s25  ;;  %s35_s26 = sadd.s32 1, %s2001_s29 }
  0x34   : > { %s32_s8 = ssub.s32 %s2005_s30, %s2162_s25  ;;  %p42_p1 = scmp.ne.s32.totalorder %s2001_s29, %s1997_s28 }
  0x35   : > { %p33_p2 = scmp.eq.s32.totalorder %s32_s8, 0  ;;  %p43_p6 = scmp.eq.s32.totalorder %s2005_s30, 0 }
  0x36   : > { %p2765_p13 = scmp.eq.s32.totalorder %s2110_s0, 1  ;;  %p1650_p7 = scmp.lt.s32.totalorder %s2005_s30, 2 }
  0x37   : > { %s2178_s13 = scalar_select %p33_p2, %s2001_s29, %s35_s26  }
  0x38   : > { %1639 = dma.hbm_to_vmem [thread:$0]  (!%p2139_p12), %s2763_s4, 128, %s196_s16, [#allocation10]  }
  0x39   : > { %p2172_p5 = por %p2765_p13, %p42_p1  ;;  %2767 = sst [smem:[#allocation30_spill]] %s2178_s13 }
  0x3a   : > { %p44_p10 = por %p43_p6, %p42_p1  ;;  %s212_s14 = sand.u32 1, %s2001_s29  }
  0x3b   : > { %s2766_s12 = scalar_select %p2172_p5, 1, 0 }
  0x3c   : > { %s1470_s15 = sshll.u32 %s212_s14, 3  ;;  %s1471_s16 = sshll.u32 %s2005_s30, 7 }
  0x3d   : > { %s2768_s1 = sld [smem:[#allocation33_spill]]  ;;  %s216_s20 = scalar_lea.vmem [#allocation6], %s1470_s15 }
  0x3e   : > { %s223_s21 = sshll.u32 %s216_s20, 4  ;;  %p2187_p12 = pnand %p1650_p7, %p44_p10  ;;  %s224_s21 = int_to_ptr.vmem [resolvable:$true] %s223_s21 }
  0x3f   : > { %s213_s23 = scalar_lea.sflag [#allocation7], %s212_s14 }
  0x40   : > { %p1839_p3 = pneg %p2187_p12 }
  0x43   : > { %s2185_s19 = scalar_lea.hbm %s2768_s1, %s1471_s16  ;;  %s1842_s16 = scalar_lea.hbm %s2768_s1, 256 }
  0x44   : > { %s1837_s24 = scalar_lea.hbm %s2185_s19, 128  ;;  %p1843_p1 = scmp.lt.s32.totalorder %s2185_s19, %s2768_s1 }
  0x45   : > { %p1838_p0 = scmp.ne.s32.totalorder %s2185_s19, %s1837_s24  ;;  %p1844_p2 = scmp.lt.s32.totalorder %s1842_s16, %s1837_s24 }
  0x47   : > { %p1840_p11 = pnand %p1839_p3, %p1838_p0  ;;  %p1845_p6 = por %p1844_p2, %p1843_p1 }
  0x49   : > { %p1841_p8 = pneg %p1840_p11 }
  0x4b   : > { %p1846_p13 = pnand %p1845_p6, %p1841_p8 }
  0x4d   : > { %1849 = shalt.err (!%p1846_p13)
}
  0x4e   : > { %s1850_s18 = scalar_lea.vmem %s224_s21, 128  ;;  %s2036_s14 = smov [#allocation6]  }
  0x4f   : > { %p1851_p7 = scmp.ne.s32.totalorder %s224_s21, %s1850_s18  ;;  %s1855_s20 = sshll.u32 %s2036_s14, 4  ;;  %s1856_s20 = int_to_ptr.vmem [resolvable:$false] %s1855_s20 }
  0x50   : > { %s1857_s3 = scalar_lea.vmem %s1856_s20, 256  ;;  %p1858_p0 = scmp.lt.s32.totalorder %s224_s21, %s1856_s20 }
  0x51   : > { %p1853_p10 = pnand %p1851_p7, %p1839_p3  ;;  %p1859_p11 = scmp.lt.s32.totalorder %s1857_s3, %s1850_s18 }
  0x53   : > { %p1854_p5 = pneg %p1853_p10  ;;  %p1860_p4 = por %p1859_p11, %p1858_p0 }
  0x55   : > { %p1861_p9 = pnand %p1860_p4, %p1854_p5 }
  0x57   : > { %1864 = shalt.err (!%p1861_p9)
}
  0x58   : > { %1643 = dma.hbm_to_vmem [thread:$0]  (!%p2187_p12), %s2185_s19, 128, %s224_s21, %s213_s23  }
  0x59   : > { %p2770_p8 = scmp.ne.s32.totalorder %s2760_s11, 0 }
  0x5b   : > { %232 = sbr.rel (%p2770_p8) target bundleno = 1144 (0x478), region = 40 }
  0x60   : > { %s2208_s24 = sand.u32 1, %s1997_s28   ;;  %p2771_p3 = scmp.ne.s32.totalorder %s2757_s9, 0 }
  0x61   : > { %s1473_s26 = sshll.u32 %s2208_s24, 3  ;;  %s235_s8 = scalar_lea.sflag [#allocation7], %s2208_s24 }
  0x62   : > { %s2212_s16 = scalar_lea.vmem [#allocation6], %s1473_s26 }
  0x63   : > { %1978 = dma.done.wait (%p2771_p3), %s235_s8, 128  }
  0x64   : > { %1980 = vsyncadd (%p2771_p3), %s235_s8, 4294967168  ;;  %p2772_p4 = scmp.eq.s32.totalorder %s2110_s0, 0 }
  0x66   : > { %1982 = dma.done.wait (%p2772_p4), [#allocation10], 512   ;;  %p2773_p9 = pmov %p2772_p4 }
  0x67   : > { %s1476_s3 = sshll.u32 %s2208_s24, 7  ;;  %p274_p5 = scmp.lt.s32.totalorder %s2110_s0, 0 }
  0x68   : > { %1984 = vsyncadd (%p2773_p9), [#allocation10], 4294966784  ;;  %s275_s11 = ssub.s32 0, %s2110_s0  ;;  %s2228_s23 = scalar_lea.vmem [#allocation12], %s1476_s3 }
  0x69   : > { %s1477_s19 = smin.u32 %s2110_s0, %s275_s11  ;;  %p2774_p1 = scmp.ne.s32.totalorder %s2110_s0, 0 }
  0x6a   : > { %s277_s21 = sand.u32 1, %s1477_s19   ;;  %s2232_s17 = smov (!%p2774_p1), 0  }
  0x6b   : > { %s278_s22 = ssub.s32 0, %s277_s21  ;;  %289 = sbr.rel (%p2774_p1) target bundleno = 154 (0x9a), region = 56 }
  0x6c   : > { %s2793_s22 = smov (!%p274_p5, %s278_s22), %s277_s21 }
  0x6d   : > { %p1479_p12 = scmp.lt.s32.totalorder %s2793_s22, 0  ;;  %s284_s9 = sadd.s32 2, %s2793_s22 }
  0x6f   : > { %s2795_s9 = smov (!%p1479_p12, %s284_s9), %s2793_s22 }
  0x70 LB: >> { %s1481_s15 = sshll.u32 %s2009_s17, 4  ;;  %s2238_s18 = smov 0   ;;  %s2009_s17 = sphi %s2232_s17, %s295_s17  }
  0x71 LB: >>> { %s303_s14 = sadd.s32 %s2013_s18, %s1481_s15  ;;  %s1867_s13 = scalar_lea.hbm %s2732_s2, 8192  ;;  %s2013_s18 = sphi %s2238_s18, %s302_s18  }
  0x72   : >>> { %s304_s20 = sld [smem:[#allocation5 + %s303_s14]]  ;;  %s308_s26 = scalar_lea.vmem [#allocation2], %s303_s14 }
  0x73   : >>> { %s316_s8 = sshll.u32 %s308_s26, 4  ;;  %s317_s8 = int_to_ptr.vmem [resolvable:$true] %s316_s8 }
  0x78   : >>> { %s1482_s3 = sshll.u32 %s304_s20, 4 }
  0x79   : >>> { %s306_s21 = scalar_lea.hbm %s2732_s2, %s1482_s3 }
  0x7a   : >>> { %s1865_s22 = scalar_lea.hbm %s306_s21, 16  ;;  %p1868_p6 = scmp.lt.s32.totalorder %s306_s21, %s2732_s2 }
  0x7b   : >>> { %p1866_p2 = scmp.ne.s32.totalorder %s306_s21, %s1865_s22  ;;  %p1869_p13 = scmp.lt.s32.totalorder %s1867_s13, %s1865_s22 }
  0x7d   : >>> { %p1870_p7 = por %p1869_p13, %p1868_p6 }
  0x7f   : >>> { %p1871_p10 = pnand %p1870_p7, %p1866_p2 }
  0x81   : >>> { %1874 = shalt.err (!%p1871_p10)  }
  0x82   : >>> { %s1875_s14 = scalar_lea.vmem %s317_s8, 16  ;;  %s2037_s20 = smov [#allocation2]  }
  0x83   : >>> { %p1876_p0 = scmp.ne.s32.totalorder %s317_s8, %s1875_s14  ;;  %s1877_s26 = sshll.u32 %s2037_s20, 4  ;;  %s1878_s26 = int_to_ptr.vmem [resolvable:$false] %s1877_s26 }
  0x84   : >>> { %s1879_s3 = scalar_lea.vmem %s1878_s26, 4096  ;;  %p1880_p11 = scmp.lt.s32.totalorder %s317_s8, %s1878_s26 }
  0x85   : >>> { %p1881_p8 = scmp.lt.s32.totalorder %s1879_s3, %s1875_s14 }
  0x87   : >>> { %p1882_p3 = por %p1881_p8, %p1880_p11 }
  0x89   : >>> { %p1883_p4 = pnand %p1882_p3, %p1876_p0 }
  0x8b   : >>> { %1886 = shalt.err (!%p1883_p4)  }
  0x8c   : >>> { %319 = dma.hbm_to_vmem [thread:$0]  %s306_s21, 16, %s317_s8, [#allocation3] }
  0x8d   : >>> { %s302_s18 = sadd.s32 1, %s2013_s18  }
  0x8e   : >>> { %p299_p9 = scmp.ge.s32.totalorder %s302_s18, 16  }
  0x8f   : >> { %s295_s17 = sadd.s32 (%p299_p9), 1, %s2009_s17  }
  0x90   : >> { %301 = sbr.rel (!%p299_p9) target bundleno = 113 (0x71), region = 159  ;;  %p292_p5 = scmp.ge.s32.totalorder (%p299_p9), %s295_s17, 8  }
  0x95   : > { %294 = sbr.rel (!%p292_p5) target bundleno = 112 (0x70), region = 170 }
  0x9a PF: > { %s320_s1 = sadd.s32 1, %s2110_s0 }
  0x9b   : > { %p1483_p12 = scmp.ge.s32.totalorder %s320_s1, 2 }
  0x9d   : > { %324 = sbr.rel (%p1483_p12) target bundleno = 220 (0xdc), region = 78 }
  0xa2   : > { %s325_s4 = ssub.s32 1, %s2795_s9  ;;  %s1543_s28 = sshll.u32 %s2110_s0, 7 }
  0xa3   : > { %s2264_s29 = sadd.s32 128, %s1543_s28  ;;  %s2266_s13 = smov 0  }
  0xa4   : > { %2775 = sst [smem:[#allocation31_spill]] %s2264_s29 }
  0xa5 LB: >> { %s2776_s29 = sld [smem:[#allocation31_spill]]  ;;  %s2749_s17 = sshll.u32 %s2017_s13, 4  ;;  %s2017_s13 = sphi %s2266_s13, %s332_s13  }
  0xa6   : >> { %s2277_s18 = smov 0  }
  0xab   : >> { %s2275_s15 = sadd.s32 %s2776_s29, %s2749_s17 }
  0xac   : >> { %2777 = sst [smem:[#allocation32_spill]] %s2275_s15 }
  0xad LB: >>> { %s2778_s15 = sld [smem:[#allocation32_spill]]  ;;  %s1487_s8 = sshll.u32 %s325_s4, 7  ;;  %s2021_s18 = sphi %s2277_s18, %s340_s18  }
  0xae   : >>> { %s2779_s17 = sshll.u32 %s2017_s13, 4  ;;  %s349_s29 = scalar_lea.sflag [#allocation3], %s325_s4 }
  0xaf   : >>> { %s345_s19 = sadd.s32 %s2021_s18, %s2779_s17 }
  0xb0   : >>> { %s347_s22 = sadd.s32 %s1487_s8, %s345_s19 }
  0xb1   : >>> { %s348_s14 = scalar_lea.vmem [#allocation2], %s347_s22 }
  0xb2   : >>> { %s357_s20 = sshll.u32 %s348_s14, 4  ;;  %s358_s20 = int_to_ptr.vmem [resolvable:$true] %s357_s20 }
  0xb3   : >>> { %s341_s11 = sadd.s32 %s2021_s18, %s2778_s15  ;;  %s1889_s15 = scalar_lea.hbm %s2732_s2, 8192 }
  0xb4   : >>> { %s342_s21 = sld [smem:[#allocation5 + %s341_s11]] }
  0xba   : >>> { %s1486_s26 = sshll.u32 %s342_s21, 4 }
  0xbb   : >>> { %s344_s28 = scalar_lea.hbm %s2732_s2, %s1486_s26 }
  0xbc   : >>> { %s1887_s25 = scalar_lea.hbm %s344_s28, 16  ;;  %p1890_p2 = scmp.lt.s32.totalorder %s344_s28, %s2732_s2 }
  0xbd   : >>> { %p1888_p1 = scmp.ne.s32.totalorder %s344_s28, %s1887_s25  ;;  %p1891_p6 = scmp.lt.s32.totalorder %s1889_s15, %s1887_s25 }
  0xbf   : >>> { %p1892_p13 = por %p1891_p6, %p1890_p2 }
  0xc1   : >>> { %p1893_p7 = pnand %p1892_p13, %p1888_p1 }
  0xc3   : >>> { %1896 = shalt.err (!%p1893_p7)  }
  0xc4   : >>> { %s1897_s8 = scalar_lea.vmem %s358_s20, 16  ;;  %s2038_s11 = smov [#allocation2]  }
  0xc5   : >>> { %p1898_p10 = scmp.ne.s32.totalorder %s358_s20, %s1897_s8  ;;  %s1899_s19 = sshll.u32 %s2038_s11, 4  ;;  %s1900_s19 = int_to_ptr.vmem [resolvable:$false] %s1899_s19 }
  0xc6   : >>> { %s1901_s21 = scalar_lea.vmem %s1900_s19, 4096  ;;  %p1902_p0 = scmp.lt.s32.totalorder %s358_s20, %s1900_s19 }
  0xc7   : >>> { %p1903_p11 = scmp.lt.s32.totalorder %s1901_s21, %s1897_s8 }
  0xc9   : >>> { %p1904_p8 = por %p1903_p11, %p1902_p0 }
  0xcb   : >>> { %p1905_p3 = pnand %p1904_p8, %p1898_p10 }
  0xcd   : >>> { %1908 = shalt.err (!%p1905_p3)  }
  0xce   : >>> { %360 = dma.hbm_to_vmem [thread:$0]  %s344_s28, 16, %s358_s20, %s349_s29 }
  0xcf   : >>> { %s340_s18 = sadd.s32 1, %s2021_s18  }
  0xd0   : >>> { %p337_p4 = scmp.ge.s32.totalorder %s340_s18, 16  }
  0xd1   : >> { %s332_s13 = sadd.s32 (%p337_p4), 1, %s2017_s13  }
  0xd2   : >> { %339 = sbr.rel (!%p337_p4) target bundleno = 173 (0xad), region = 181  ;;  %p329_p9 = scmp.ge.s32.totalorder (%p337_p4), %s332_s13, 8  }
  0xd7   : > { %331 = sbr.rel (!%p329_p9) target bundleno = 165 (0xa5), region = 192 }
  0xdc PF: > { %v365_v0 = vlaneseq  ;;  %v2039_v1 = vmov 0.0   ;;  %vm2040_vm0 = vmmov 0   ;;  %v361_v2 = vld [vmem:[%s2212_s16] sm:$0xff]  ;;  %v2041_v6 = vmov 1.0   ;;  %v590_v9 = vld [vmem:[#allocation9 + $0x8] sm:$0xff]  ;;  %v589_v13 = vld [vmem:[#allocation9] sm:$0xff] }
  0xdd   : > { %1571 = vmatprep.subr.mxu0 %v2039_v1  ;;  %1575 = vmatprep.mubr.msk.f32.mxu0 %vm2040_vm0, %v2039_v1  ;;  %vm362_vm1 = vcmp.ne.s32.totalorder %v361_v2, 1  ;;  %vm376_vm4 = vcmask 130048   ;;  %v591_v8 = vld [vmem:[#allocation9 + $0x10] sm:$0x3]  ;;  %vm641_vm5 = vcmask 1041408   ;;  %s1527_s27 = sshll.u32 %s2110_s0, 3 }
  0xde   : > { %v2310_v3 = vshrl.u32 %v365_v0, 7  ;;  %v2312_v4 = vand.u32 127, %v365_v0  ;;  %v1488_v7 = vsel %vm362_vm1, 1.0, %v2039_v1  ;;  %1613 = vmatprep.subr.msk.mxu1 %vm641_vm5, %v591_v8  ;;  %v791_v33 = vstv %s1527_s27  ;;  %v808_v45 = vld [vmem:[#allocation11] sm:$0xff]  ;;  %s2023_s30 = smov 0  }
  0xdf   : > { %1616 = vmatpush3.msk.msra.mxu1 %vm641_vm5, %v591_v8  ;;  %vm592_vm7 = vcmask 146432  }
  0xe0   : > { %v367_v5 = vadd.s32 8, %v2310_v3  ;;  %vm370_vm3 = vcmp.le.s32.totalorder %v2310_v3, %v2312_v4  ;;  %1614 = vmatprep.subr.mxu1 %v590_v9  ;;  %v466_v16 = vsub.s32 1, %v2310_v3  ;;  %v2322_v17 = vsub.s32 0, %v2310_v3 }
  0xe1   : > { %1617 = vmatpush3.msra.mxu1 %v590_v9  ;;  %v477_v21 = vsub.s32 2, %v2310_v3  ;;  %v488_v22 = vsub.s32 3, %v2310_v3  ;;  %v499_v25 = vsub.s32 4, %v2310_v3  ;;  %v510_v27 = vsub.s32 5, %v2310_v3 }
  0xe2   : > { %vm371_vm2 = vcmp.le.s32.totalorder %v367_v5, %v2312_v4  ;;  %1615 = vmatprep.subr.mxu1 %v589_v13  ;;  %v521_v29 = vsub.s32 6, %v2310_v3  ;;  %v532_v31 = vsub.s32 7, %v2310_v3  ;;  %v792_v34 = vadd.s32 %v791_v33, %v2310_v3 }
  0xe3   : > { %1572 = vmatpush3.msk.msra.mxu0 %vm371_vm2, %v2041_v6  ;;  %1618 = vmatpush3.msra.mxu1 %v589_v13 }
  0xe4   : > { %1573 = vmatprep.subr.mxu0 %v2039_v1  ;;  %v794_v35 = vsub.s32 0, %v792_v34  ;;  %vm793_vm6 = vcmp.lt.s32.totalorder %v792_v34, 0 }
  0xe5   : > { %1574 = vmatpush3.msk.msra.mxu0 %vm370_vm3, %v2041_v6 }
  0xe6   : > { %1576 = vmatmul.mubr.msk.f32.vlgmr.msra.gmra.mxu0 %vm376_vm4, %v1488_v7  ;;  %1578 = vmatprep.subr.msk.mxu0 %vm641_vm5, %v591_v8  ;;  %v1528_v36 = vmin.u32 %v794_v35, %v792_v34 }
  0xe7   : > { %1579 = vmatpush3.msk.msra.mxu0 %vm641_vm5, %v591_v8  ;;  %vm809_vm5 = vcmask 64512  }
  0xe8   : > { %1580 = vmatprep.subr.mxu0 %v590_v9  ;;  %v797_v37 = vand.u32 3, %v1528_v36 }
  0xe9   : > { %1581 = vmatpush3.msra.mxu0 %v590_v9 }
  0xea   : > { %1582 = vmatprep.subr.mxu0 %v589_v13  ;;  %v798_v38 = vsub.s32 0, %v797_v37 }
  0xeb   : > { %1583 = vmatpush3.msra.mxu0 %v589_v13 }
  0xec   : > { %1608 = vmatprep.subr.mxu0 %v2039_v1  ;;  %v799_v41 = vsel %vm793_vm6, %v798_v38, %v797_v37 }
  0xed   : > { %vm800_vm10 = vcmp.ne.s32.totalorder %v799_v41, 0  ;;  %vm801_vm11 = vcmp.lt.s32.totalorder %v799_v41, 0  ;;  %v803_v47 = vadd.s32 4, %v799_v41 }
  0xee   : > { %vm2343_vm14 = vmand %vm801_vm11, %vm800_vm10 }
  0xef   : > { %v804_v55 = vsel %vm2343_vm14, %v803_v47, %v799_v41 }
  0xf0   : > { %vm805_vm4 = vcmp.eq.s32.totalorder %v2312_v4, %v804_v55 }
  0xf1   : > { %v1529_v62 = vsel %vm805_vm4, 1.0, %v2039_v1 }
 0x1a6   : > { %v446_v10 = vpop.f32.mrf.mxu0 }
 0x1a7   : > { %v450_v11 = vmul.f32 %v1488_v7, %v446_v10 }
 0x1a8   : > { %v1577_v12 = vpop.f32.mrf.mxu0 }
 0x1a9   : > { %v1619_v14 = vtrunc.f32 %v450_v11 }
 0x1ab   : > { %v1620_v15 = vcvt.f32.s32 %v1619_v14 }
 0x1ad   : > { %v452_v18 = vadd.s32 1, %v1620_v15 }
 0x1af   : > { %v467_v19 = vrot.slane %v452_v18, %v466_v16  ;;  %v456_v20 = vrot.slane %v452_v18, %v2322_v17  ;;  %v478_v23 = vrot.slane %v452_v18, %v477_v21  ;;  %v489_v24 = vrot.slane %v452_v18, %v488_v22 }
 0x1b0   : > { %v500_v26 = vrot.slane %v452_v18, %v499_v25  ;;  %v511_v28 = vrot.slane %v452_v18, %v510_v27  ;;  %v522_v30 = vrot.slane %v452_v18, %v521_v29  ;;  %v533_v32 = vrot.slane %v452_v18, %v532_v31 }
 0x1b1   : > { %469 = vbcast.lane.b32.xlu1 %v467_v19, 256  ;;  %458 = vbcast.lane.b32.xlu0 %v456_v20, 256  ;;  %v2042_v18 = vmov 1966171168  }
 0x1b5   : > { %473 = vbcast.lane.b32.xlu1 %v467_v19, 264  ;;  %462 = vbcast.lane.b32.xlu0 %v456_v20, 264  ;;  %v892_v19 = vunpack.c.l.s4 %v2042_v18 }
 0x1b7   : > { %v893_v22 = vunpack.c.0.s8 %v892_v19 }
 0x1b9   : > { %480 = vbcast.lane.b32.xlu1 %v478_v23, 256  ;;  %491 = vbcast.lane.b32.xlu0 %v489_v24, 256  ;;  %v896_v25 = vsub.s32 %v893_v22, %v2310_v3 }
 0x1bd   : > { %484 = vbcast.lane.b32.xlu1 %v478_v23, 264  ;;  %495 = vbcast.lane.b32.xlu0 %v489_v24, 264 }
 0x1c1   : > { %506 = vbcast.lane.b32.xlu1 %v500_v26, 264  ;;  %502 = vbcast.lane.b32.xlu0 %v500_v26, 256 }
 0x1c5   : > { %517 = vbcast.lane.b32.xlu1 %v511_v28, 264  ;;  %513 = vbcast.lane.b32.xlu0 %v511_v28, 256 }
 0x1c9   : > { %528 = vbcast.lane.b32.xlu1 %v522_v30, 264  ;;  %524 = vbcast.lane.b32.xlu0 %v522_v30, 256 }
 0x1cd   : > { %539 = vbcast.lane.b32.xlu1 %v533_v32, 264  ;;  %535 = vbcast.lane.b32.xlu0 %v533_v32, 256 }
 0x223   : > { %v470_v39 = vpop.permute.xlu1 %469  ;;  %v459_v40 = vpop.permute.xlu0 %458 }
 0x224   : > { %vm541_vm8 = vcmp.eq.s32.totalorder %v2312_v4, %v459_v40  ;;  %vm543_vm9 = vcmp.eq.s32.totalorder %v2312_v4, %v470_v39 }
 0x225   : > { %v1494_v42 = vsel %vm541_vm8, 1.0, %v2039_v1  ;;  %v1496_v48 = vsel %vm543_vm9, 1.0, %v2039_v1 }
 0x226   : > { %1584 = vmatprep.mubr.msk.f32.mxu0 %vm592_vm7, %v1494_v42 }
 0x227   : > { %v474_v43 = vpop.permute.xlu1 %473  ;;  %v463_v44 = vpop.permute.xlu0 %462 }
 0x228   : > { %vm542_vm12 = vcmp.eq.s32.totalorder %v2312_v4, %v463_v44  ;;  %vm544_vm13 = vcmp.eq.s32.totalorder %v2312_v4, %v474_v43 }
 0x229   : > { %v1495_v46 = vsel %vm542_vm12, 1.0, %v2039_v1  ;;  %v1497_v52 = vsel %vm544_vm13, 1.0, %v2039_v1 }
 0x22a   : > { %1585 = vmatmul.mubr.msk.f32.vlgmr.msra.gmra.mxu0 %vm592_vm7, %v1495_v46 }
 0x22b   : > { %v481_v50 = vpop.permute.xlu1 %480  ;;  %1587 = vmatprep.mubr.msk.f32.mxu0 %vm592_vm7, %v1496_v48  ;;  %v492_v51 = vpop.permute.xlu0 %491  ;;  %1609 = vmatpush3.msra.mxu0 %v808_v45 }
 0x22c   : > { %vm545_vm15 = vcmp.eq.s32.totalorder %v2312_v4, %v481_v50  ;;  %vm547_vm1 = vcmp.eq.s32.totalorder %v2312_v4, %v492_v51 }
 0x22d   : > { %v1498_v53 = vsel %vm545_vm15, 1.0, %v2039_v1  ;;  %v1500_v54 = vsel %vm547_vm1, 1.0, %v2039_v1 }
 0x22e   : > { %1588 = vmatmul.mubr.msk.f32.gmra.mxu0 %vm592_vm7, %v1497_v52  ;;  %1593 = vmatprep.mubr.msk.f32.mxu1 %vm592_vm7, %v1500_v54 }
 0x22f   : > { %v485_v56 = vpop.permute.xlu1 %484  ;;  %1590 = vmatprep.mubr.msk.f32.mxu0 %vm592_vm7, %v1498_v53  ;;  %v496_v57 = vpop.permute.xlu0 %495 }
 0x230   : > { %vm546_vm2 = vcmp.eq.s32.totalorder %v2312_v4, %v485_v56  ;;  %vm548_vm3 = vcmp.eq.s32.totalorder %v2312_v4, %v496_v57 }
 0x231   : > { %v1499_v58 = vsel %vm546_vm2, 1.0, %v2039_v1  ;;  %v1501_v59 = vsel %vm548_vm3, 1.0, %v2039_v1 }
 0x232   : > { %1591 = vmatmul.mubr.msk.f32.gmra.mxu0 %vm592_vm7, %v1499_v58  ;;  %1594 = vmatmul.mubr.msk.f32.vlgmr.msra.gmra.mxu1 %vm592_vm7, %v1501_v59 }
 0x233   : > { %v507_v60 = vpop.permute.xlu1 %506  ;;  %v503_v61 = vpop.permute.xlu0 %502  ;;  %1610 = vmatprep.mubr.msk.f32.mxu0 %vm2040_vm0, %v2039_v1 }
 0x234   : > { %vm550_vm6 = vcmp.eq.s32.totalorder %v2312_v4, %v507_v60  ;;  %vm549_vm8 = vcmp.eq.s32.totalorder %v2312_v4, %v503_v61 }
 0x235   : > { %v1503_v63 = vsel %vm550_vm6, 1.0, %v2039_v1  ;;  %v1502_v0 = vsel %vm549_vm8, 1.0, %v2039_v1 }
 0x236   : > { %1596 = vmatprep.mubr.msk.f32.mxu1 %vm592_vm7, %v1502_v0  ;;  %1611 = vmatmul.mubr.msk.f32.vlgmr.msra.gmra.mxu0 %vm809_vm5, %v1529_v62 }
 0x237   : > { %v518_v2 = vpop.permute.xlu1 %517  ;;  %1597 = vmatmul.mubr.msk.f32.gmra.mxu1 %vm592_vm7, %v1503_v63  ;;  %v514_v5 = vpop.permute.xlu0 %513 }
 0x238   : > { %vm552_vm0 = vcmp.eq.s32.totalorder %v2312_v4, %v518_v2  ;;  %vm551_vm9 = vcmp.eq.s32.totalorder %v2312_v4, %v514_v5 }
 0x239   : > { %v1505_v6 = vsel %vm552_vm0, 1.0, %v2039_v1  ;;  %v1504_v7 = vsel %vm551_vm9, 1.0, %v2039_v1 }
 0x23a   : > { %1599 = vmatprep.mubr.msk.f32.mxu1 %vm592_vm7, %v1504_v7 }
 0x23b   : > { %v529_v8 = vpop.permute.xlu1 %528  ;;  %1600 = vmatmul.mubr.msk.f32.gmra.mxu1 %vm592_vm7, %v1505_v6  ;;  %v525_v9 = vpop.permute.xlu0 %524 }
 0x23c   : > { %vm554_vm10 = vcmp.eq.s32.totalorder %v2312_v4, %v529_v8  ;;  %vm553_vm11 = vcmp.eq.s32.totalorder %v2312_v4, %v525_v9 }
 0x23d   : > { %v1507_v10 = vsel %vm554_vm10, 1.0, %v2039_v1  ;;  %v1506_v11 = vsel %vm553_vm11, 1.0, %v2039_v1 }
 0x23e   : > { %1602 = vmatprep.mubr.msk.f32.mxu1 %vm592_vm7, %v1506_v11 }
 0x23f   : > { %v540_v12 = vpop.permute.xlu1 %539  ;;  %1603 = vmatmul.mubr.msk.f32.gmra.mxu1 %vm592_vm7, %v1507_v10  ;;  %v536_v13 = vpop.permute.xlu0 %535 }
 0x240   : > { %vm556_vm12 = vcmp.eq.s32.totalorder %v2312_v4, %v540_v12  ;;  %vm555_vm13 = vcmp.eq.s32.totalorder %v2312_v4, %v536_v13 }
 0x241   : > { %v1509_v14 = vsel %vm556_vm12, 1.0, %v2039_v1  ;;  %v1508_v15 = vsel %vm555_vm13, 1.0, %v2039_v1 }
 0x242   : > { %1605 = vmatprep.mubr.msk.f32.mxu1 %vm592_vm7, %v1508_v15 }
 0x243   : > { %1606 = vmatmul.mubr.msk.f32.gmra.mxu1 %vm592_vm7, %v1509_v14  ;;  %vm883_vm7 = vcmp.eq.s32.totalorder %v2310_v3, 1 }
 0x244   : > { %v1531_v37 = vsel %vm883_vm7, 1.0, %v2039_v1 }
 0x2ea   : > { %v2392_v16 = vpop.f32.mrf.mxu0 }
 0x2ec   : > { %v2394_v20 = vpop.f32.mrf.mxu0 }
 0x2ee   : > { %v2396_v21 = vpop.f32.mrf.mxu0 }
 0x2f0   : > { %v2398_v23 = vpop.f32.mrf.mxu0 }
 0x2f2   : > { %v2400_v4 = vpop.f32.mrf.mxu0  ;;  %v2402_v24 = vpop.f32.mrf.mxu1 }
 0x2f4   : > { %v2405_v26 = vpop.f32.mrf.mxu0  ;;  %v2407_v27 = vpop.f32.mrf.mxu1 }
 0x2f6   : > { %v879_v28 = vpop.f32.mrf.mxu0 }
 0x2f7   : > { %v890_v29 = vcombine.high %v879_v28, %v879_v28  ;;  %v897_v30 = vrot.slane %v879_v28, %v896_v25  ;;  %v2410_v31 = vpop.f32.mrf.mxu1 }
 0x2f8   : > { %v1612_v32 = vpop.f32.mrf.mxu0 }
 0x2f9   : > { %v904_v33 = vrot.slane %v890_v29, %v896_v25  ;;  %v905_v34 = vcombine.high %v897_v30, %v897_v30  ;;  %v913_v35 = vrot.slane %v897_v30, %v896_v25  ;;  %v2412_v36 = vpop.f32.mrf.mxu1 }
 0x2fb   : > { %v906_v38 = vcombine.high %v904_v33, %v904_v33  ;;  %v920_v39 = vrot.slane %v904_v33, %v896_v25  ;;  %v927_v40 = vrot.slane %v905_v34, %v896_v25  ;;  %v935_v41 = vcombine.high %v913_v35, %v913_v35  ;;  %v2415_v42 = vpop.f32.mrf.mxu1 }
 0x2fc   : > { %v942_v3 = vrot.slane %v913_v35, %v2322_v17 }
 0x2fd   : > { %v934_v43 = vrot.slane %v906_v38, %v896_v25  ;;  %v936_v44 = vcombine.high %v920_v39, %v920_v39  ;;  %v937_v45 = vcombine.high %v927_v40, %v927_v40  ;;  %v946_v46 = vrot.slane %v927_v40, %v2322_v17  ;;  %v2419_v47 = vpop.f32.mrf.mxu1 }
 0x2fe   : > { %v950_v48 = vrot.slane %v935_v41, %v2322_v17  ;;  %v958_v49 = vrot.slane %v920_v39, %v2322_v17  ;;  %v979_v1 = vmul.f32 %v1531_v37, %v942_v3  ;;  %v980_v50 = vmul.f32 0.0, %v942_v3 }
 0x2ff   : > { %v938_v51 = vcombine.high %v934_v43, %v934_v43  ;;  %v954_v52 = vrot.slane %v937_v45, %v2322_v17  ;;  %v962_v53 = vrot.slane %v934_v43, %v2322_v17  ;;  %v966_v54 = vrot.slane %v936_v44, %v2322_v17  ;;  %v2426_v55 = vpop.f32.mrf.mxu1 }
 0x300   : > { %v981_v56 = vmul.f32 %v1531_v37, %v946_v46  ;;  %v982_v57 = vmul.f32 0.0, %v946_v46  ;;  %v983_v58 = vmul.f32 %v1531_v37, %v950_v48  ;;  %v984_v59 = vmul.f32 0.0, %v950_v48 }
 0x301   : > { %v970_v60 = vrot.slane %v938_v51, %v2322_v17  ;;  %v985_v61 = vmul.f32 %v1531_v37, %v954_v52  ;;  %v2429_v62 = vmul.f32 0.0, %v954_v52  ;;  %v2431_v63 = vmul.f32 %v1531_v37, %v958_v49  ;;  %v2433_v0 = vpop.f32.mrf.mxu1 }
 0x302   : > { %v2435_v2 = vmul.f32 0.0, %v958_v49  ;;  %v2437_v5 = vmul.f32 %v1531_v37, %v962_v53  ;;  %v2439_v6 = vmul.f32 0.0, %v962_v53  ;;  %v2441_v7 = vmul.f32 %v1531_v37, %v966_v54 }
 0x303   : > { %v2443_v8 = vmul.f32 0.0, %v966_v54  ;;  %v2445_v9 = vmul.f32 %v1531_v37, %v970_v60  ;;  %v2447_v17 = vmul.f32 0.0, %v970_v60  ;;  %v2449_v10 = vpop.f32.mrf.mxu1 }
 0x305   : > { %v2451_v11 = vpop.f32.mrf.mxu1 }
 0x306 LB: >> { %s2027_s10 = smov 0   ;;  %s2025_s30 = sphi %s2023_s30, %s1000_s30  }
 0x307 LB: >>> { %s1007_s25 = scalar_lea.sflag [#allocation3], %s2795_s9  ;;  %s2029_s10 = sphi %s2027_s10, %s1006_s10  }
 0x308   : >>> { %1985 = dma.done.wait %s1007_s25, 16 }
 0x309   : >>> { %1986 = vsyncadd %s1007_s25, 4294967280  ;;  %s1006_s10 = sadd.s32 1, %s2029_s10  }
 0x30a   : >>> { %p1003_p5 = scmp.ge.s32.totalorder %s1006_s10, 16  }
 0x30b   : >> { %s1000_s30 = sadd.s32 (%p1003_p5), 1, %s2025_s30  }
 0x30c   : >> { %1005 = sbr.rel (!%p1003_p5) target bundleno = 775 (0x307), region = 203  ;;  %p997_p12 = scmp.ge.s32.totalorder (%p1003_p5), %s1000_s30, 8  }
 0x311   : > { %999 = sbr.rel (!%p997_p12) target bundleno = 774 (0x306), region = 214  ;;  %s1532_s16 = sshll.u32 (%p997_p12), %s2795_s9, 7 }
 0x312   : > { %s2455_s4 = scalar_lea.vmem (%p997_p12), [#allocation2], %s1532_s16  ;;  %s1546_s15 = sshll.u32 (%p997_p12), %s2110_s0, 11 }
 0x313   : > { %v1012_v12 = vld [vmem:[%s2455_s4] sm:$0xff] (%p997_p12)  ;;  %v1014_v13 = vld [vmem:[%s2455_s4 + $0x10] sm:$0xff] (%p997_p12)  ;;  %v1013_v14 = vld [vmem:[%s2455_s4 + $0x8] sm:$0xff] (%p997_p12)  ;;  %s1314_s18 = sshll.u32 (%p997_p12), %s2228_s23, 4  ;;  %s2683_s20 = scalar_lea.hbm (%p997_p12), %s2737_s7, %s1546_s15  ;;  %s2685_s18 = int_to_ptr.vmem [resolvable:$true] %s1314_s18 }
 0x314   : > { %v1028_v15 = vadd.f32 (%p997_p12), %v1012_v12, %v2394_v20  ;;  %v1030_v18 = vadd.f32 (%p997_p12), %v1014_v13, %v2398_v23  ;;  %v1029_v19 = vadd.f32 (%p997_p12), %v2392_v16, %v1013_v14  ;;  %v1015_v22 = vld [vmem:[%s2455_s4 + $0x18] sm:$0xff] (%p997_p12)  ;;  %v1016_v25 = vld [vmem:[%s2455_s4 + $0x20] sm:$0xff] (%p997_p12)  ;;  %v1017_v29 = vld [vmem:[%s2455_s4 + $0x28] sm:$0xff] (%p997_p12)  ;;  %s1300_s0 = scalar_lea.sflag (%p997_p12), [#allocation8], %s2208_s24  ;;  %s1909_s26 = scalar_lea.vmem (%p997_p12), %s2685_s18, 2048 }
 0x315   : > { %v1031_v28 = vadd.f32 (%p997_p12), %v2396_v21, %v1015_v22  ;;  %v1032_v33 = vadd.f32 (%p997_p12), %v1016_v25, %v2405_v26  ;;  %v1033_v35 = vadd.f32 (%p997_p12), %v2400_v4, %v1017_v29  ;;  %v1018_v23 = vld [vmem:[%s2455_s4 + $0x30] sm:$0xff] (%p997_p12)  ;;  %v1019_v16 = vld [vmem:[%s2455_s4 + $0x38] sm:$0xff] (%p997_p12)  ;;  %v1020_v26 = vld [vmem:[%s2455_s4 + $0x40] sm:$0xff] (%p997_p12)  ;;  %p1910_p1 = scmp.ne.s32.totalorder (%p997_p12), %s2685_s18, %s1909_s26  ;;  %p2782_p2 = scmp.ne.s32.totalorder (%p997_p12), %s2766_s12, 0 }
 0x316   : > { %v1044_v30 = vadd.f32 %v1028_v15, %v979_v1  ;;  %v1046_v32 = vadd.f32 %v1030_v18, %v981_v56  ;;  %v1045_v34 = vadd.f32 %v1029_v19, %v980_v50  ;;  %v1034_v37 = vadd.f32 %v1018_v23, %v2407_v27  ;;  %v1021_v40 = vld [vmem:[%s2455_s4 + $0x48] sm:$0xff]  ;;  %v1022_v43 = vld [vmem:[%s2455_s4 + $0x50] sm:$0xff]  ;;  %v1023_v44 = vld [vmem:[%s2455_s4 + $0x58] sm:$0xff]  ;;  %s2043_s3 = smov [#allocation12]  }
 0x317   : > { %v1047_v20 = vadd.f32 %v1031_v28, %v982_v57  ;;  %v1048_v21 = vadd.f32 %v1032_v33, %v983_v58  ;;  %v2472_v38 = vadd.f32 %v1033_v35, %v984_v59  ;;  %v1035_v39 = vadd.f32 %v2402_v24, %v1019_v16  ;;  %v1024_v48 = vld [vmem:[%s2455_s4 + $0x60] sm:$0xff]  ;;  %v1026_v51 = vld [vmem:[%s2455_s4 + $0x70] sm:$0xff]  ;;  %v1027_v52 = vld [vmem:[%s2455_s4 + $0x78] sm:$0xff]  ;;  %p1911_p6 = pnand %p1910_p1, %p2782_p2  ;;  %s1913_s1 = sshll.u32 %s2043_s3, 4  ;;  %s1914_s1 = int_to_ptr.vmem [resolvable:$false] %s1913_s1 }
 0x318   : > { %1060 = vadd.xlane.f32.xlu0 %v1044_v30  ;;  %1064 = vadd.xlane.f32.xlu1 %v1046_v32  ;;  %v2477_v41 = vadd.f32 %v1034_v37, %v985_v61  ;;  %v1036_v27 = vadd.f32 %v1020_v26, %v2412_v36  ;;  %v1037_v3 = vadd.f32 %v2410_v31, %v1021_v40  ;;  %v1025_v31 = vld [vmem:[%s2455_s4 + $0x68] sm:$0xff]  ;;  %s1915_s28 = scalar_lea.vmem %s1914_s1, 4096  ;;  %p1916_p7 = scmp.lt.s32.totalorder %s2685_s18, %s1914_s1 }
 0x319   : > { %v2481_v4 = vadd.f32 %v1035_v39, %v2429_v62  ;;  %v1038_v24 = vadd.f32 %v1022_v43, %v2419_v47  ;;  %v1039_v36 = vadd.f32 %v2415_v42, %v1023_v44  ;;  %v1040_v49 = vadd.f32 %v1024_v48, %v2433_v0  ;;  %p1912_p13 = pneg %p1911_p6  ;;  %p1917_p10 = scmp.lt.s32.totalorder %s1915_s28, %s1909_s26 }
 0x31a   : > { %v2491_v45 = vadd.f32 %v1036_v27, %v2431_v63  ;;  %v2494_v46 = vadd.f32 %v1037_v3, %v2435_v2  ;;  %v1041_v50 = vadd.f32 %v2426_v55, %v1025_v31  ;;  %v1042_v42 = vadd.f32 %v1026_v51, %v2451_v11 }
 0x31b   : > { %v2503_v47 = vadd.f32 %v1038_v24, %v2437_v5  ;;  %v2506_v1 = vadd.f32 %v1039_v36, %v2439_v6  ;;  %v2515_v53 = vadd.f32 %v1040_v49, %v2441_v7  ;;  %v1043_v56 = vadd.f32 %v2449_v10, %v1027_v52  ;;  %p1918_p0 = por %p1917_p10, %p1916_p7 }
 0x31c   : > { %1062 = vadd.xlane.f32.xlu0 %v1045_v34  ;;  %1066 = vadd.xlane.f32.xlu1 %v1047_v20  ;;  %v2518_v54 = vadd.f32 %v1041_v50, %v2443_v8  ;;  %v2524_v55 = vadd.f32 %v1042_v42, %v2445_v9 }
 0x31d   : > { %v2527_v57 = vadd.f32 %v1043_v56, %v2447_v17  ;;  %p1919_p11 = pnand %p1918_p0, %p1912_p13 }
 0x320   : > { %1068 = vadd.xlane.f32.xlu0 %v1048_v21  ;;  %1070 = vadd.xlane.f32.xlu1 %v2472_v38 }
 0x324   : > { %1072 = vadd.xlane.f32.xlu0 %v2477_v41  ;;  %1074 = vadd.xlane.f32.xlu1 %v2481_v4 }
 0x328   : > { %1076 = vadd.xlane.f32.xlu0 %v2491_v45  ;;  %1078 = vadd.xlane.f32.xlu1 %v2494_v46 }
 0x32c   : > { %1080 = vadd.xlane.f32.xlu0 %v2503_v47  ;;  %1082 = vadd.xlane.f32.xlu1 %v2506_v1 }
 0x330   : > { %1084 = vadd.xlane.f32.xlu0 %v2515_v53  ;;  %1086 = vadd.xlane.f32.xlu1 %v2518_v54 }
 0x334   : > { %1088 = vadd.xlane.f32.xlu0 %v2524_v55  ;;  %1090 = vadd.xlane.f32.xlu1 %v2527_v57 }
 0x3a1   : > { %v1061_v58 = vpop.xlane.xlu0 %1060  ;;  %v1065_v59 = vpop.xlane.xlu1 %1064 }
 0x3a2   : > { %v1093_v60 = vmul.f32 0.0078125, %v1061_v58  ;;  %v1095_v61 = vmul.f32 0.0078125, %v1065_v59 }
 0x3a4   : > { %v2531_v62 = vsub.f32 %v1044_v30, %v1093_v60  ;;  %v2533_v63 = vsub.f32 %v1046_v32, %v1095_v61 }
 0x3a5   : > { %v1063_v0 = vpop.xlane.xlu0 %1062  ;;  %v1067_v2 = vpop.xlane.xlu1 %1066 }
 0x3a6   : > { %v1094_v5 = vmul.f32 0.0078125, %v1063_v0  ;;  %v1125_v6 = vmul.f32 %v2531_v62, %v2531_v62  ;;  %v1096_v7 = vmul.f32 0.0078125, %v1067_v2  ;;  %v1127_v17 = vmul.f32 %v2533_v63, %v2533_v63 }
 0x3a8   : > { %v2537_v8 = vsub.f32 %v1045_v34, %v1094_v5  ;;  %1141 = vadd.xlane.f32.xlu0 %v1125_v6  ;;  %v2539_v9 = vsub.f32 %v1047_v20, %v1096_v7 }
 0x3a9   : > { %v1069_v10 = vpop.xlane.xlu0 %1068  ;;  %v1071_v11 = vpop.xlane.xlu1 %1070 }
 0x3aa   : > { %v1097_v12 = vmul.f32 0.0078125, %v1069_v10  ;;  %v1126_v13 = vmul.f32 %v2537_v8, %v2537_v8  ;;  %v1098_v14 = vmul.f32 0.0078125, %v1071_v11  ;;  %v1128_v19 = vmul.f32 %v2539_v9, %v2539_v9 }
 0x3ac   : > { %v2545_v15 = vsub.f32 %v1048_v21, %v1097_v12  ;;  %1145 = vadd.xlane.f32.xlu0 %v1127_v17  ;;  %1143 = vadd.xlane.f32.xlu1 %v1126_v13  ;;  %v2548_v18 = vsub.f32 %v2472_v38, %v1098_v14 }
 0x3ad   : > { %v1073_v22 = vpop.xlane.xlu0 %1072  ;;  %v1075_v25 = vpop.xlane.xlu1 %1074 }
 0x3ae   : > { %v1099_v28 = vmul.f32 0.0078125, %v1073_v22  ;;  %v1129_v29 = vmul.f32 %v2545_v15, %v2545_v15  ;;  %v1100_v30 = vmul.f32 0.0078125, %v1075_v25  ;;  %v1130_v34 = vmul.f32 %v2548_v18, %v2548_v18 }
 0x3b0   : > { %v2555_v32 = vsub.f32 %v2477_v41, %v1099_v28  ;;  %1147 = vadd.xlane.f32.xlu1 %v1128_v19  ;;  %1149 = vadd.xlane.f32.xlu0 %v1129_v29  ;;  %v2558_v33 = vsub.f32 %v2481_v4, %v1100_v30 }
 0x3b1   : > { %v1077_v20 = vpop.xlane.xlu0 %1076  ;;  %v1079_v35 = vpop.xlane.xlu1 %1078 }
 0x3b2   : > { %v1101_v23 = vmul.f32 0.0078125, %v1077_v20  ;;  %v1131_v16 = vmul.f32 %v2555_v32, %v2555_v32  ;;  %v1102_v37 = vmul.f32 0.0078125, %v1079_v35  ;;  %v1132_v39 = vmul.f32 %v2558_v33, %v2558_v33 }
 0x3b4   : > { %v2565_v21 = vsub.f32 %v2491_v45, %v1101_v23  ;;  %1151 = vadd.xlane.f32.xlu1 %v1130_v34  ;;  %1153 = vadd.xlane.f32.xlu0 %v1131_v16  ;;  %v2568_v38 = vsub.f32 %v2494_v46, %v1102_v37  ;;  %v2609_v37 = vld [vmem:[%s2735_s5] ss:$0 sm:$0xff] }
 0x3b5   : > { %v1081_v26 = vpop.xlane.xlu0 %1080  ;;  %v1083_v40 = vpop.xlane.xlu1 %1082 }
 0x3b6   : > { %v1103_v41 = vmul.f32 0.0078125, %v1081_v26  ;;  %v1133_v4 = vmul.f32 %v2565_v21, %v2565_v21  ;;  %v1104_v27 = vmul.f32 0.0078125, %v1083_v40  ;;  %v1134_v44 = vmul.f32 %v2568_v38, %v2568_v38 }
 0x3b8   : > { %v2575_v3 = vsub.f32 %v2503_v47, %v1103_v41  ;;  %1155 = vadd.xlane.f32.xlu1 %v1132_v39  ;;  %1157 = vadd.xlane.f32.xlu0 %v1133_v4  ;;  %v2578_v43 = vsub.f32 %v2506_v1, %v1104_v27  ;;  %v2615_v41 = vld [vmem:[%s2736_s6] ss:$0 sm:$0xff] }
 0x3b9   : > { %v1085_v24 = vpop.xlane.xlu0 %1084  ;;  %v1087_v45 = vpop.xlane.xlu1 %1086 }
 0x3ba   : > { %v1105_v46 = vmul.f32 0.0078125, %v1085_v24  ;;  %v1135_v36 = vmul.f32 %v2575_v3, %v2575_v3  ;;  %v1106_v48 = vmul.f32 0.0078125, %v1087_v45  ;;  %v1136_v47 = vmul.f32 %v2578_v43, %v2578_v43 }
 0x3bc   : > { %v2585_v31 = vsub.f32 %v2515_v53, %v1105_v46  ;;  %1159 = vadd.xlane.f32.xlu1 %v1134_v44  ;;  %1161 = vadd.xlane.f32.xlu0 %v1135_v36  ;;  %v2588_v49 = vsub.f32 %v2518_v54, %v1106_v48 }
 0x3bd   : > { %v1089_v1 = vpop.xlane.xlu0 %1088  ;;  %v1091_v50 = vpop.xlane.xlu1 %1090 }
 0x3be   : > { %v1107_v51 = vmul.f32 0.0078125, %v1089_v1  ;;  %v1137_v52 = vmul.f32 %v2585_v31, %v2585_v31  ;;  %v1108_v42 = vmul.f32 0.0078125, %v1091_v50  ;;  %v1138_v54 = vmul.f32 %v2588_v49, %v2588_v49 }
 0x3c0   : > { %v2595_v56 = vsub.f32 %v2524_v55, %v1107_v51  ;;  %1163 = vadd.xlane.f32.xlu1 %v1136_v47  ;;  %1165 = vadd.xlane.f32.xlu0 %v1137_v52  ;;  %v2598_v53 = vsub.f32 %v2527_v57, %v1108_v42 }
 0x3c2   : > { %v1139_v58 = vmul.f32 %v2595_v56, %v2595_v56  ;;  %v1140_v59 = vmul.f32 %v2598_v53, %v2598_v53 }
 0x3c4   : > { %1167 = vadd.xlane.f32.xlu1 %v1138_v54  ;;  %1169 = vadd.xlane.f32.xlu0 %v1139_v58 }
 0x3c8   : > { %1171 = vadd.xlane.f32.xlu1 %v1140_v59 }
 0x431   : > { %v1142_v60 = vpop.xlane.xlu0 %1141 }
 0x432   : > { %v1173_v55 = vmul.f32 0.0078125, %v1142_v60 }
 0x434   : > { %v1189_v61 = vadd.f32 1e-12, %v1173_v55 }
 0x435   : > { %v1144_v0 = vpop.xlane.xlu1 %1143  ;;  %v1146_v2 = vpop.xlane.xlu0 %1145 }
 0x436   : > { %1745 = vrsqrt.f32 %v1189_v61  ;;  %v1174_v57 = vmul.f32 0.0078125, %v1144_v0  ;;  %v1175_v5 = vmul.f32 0.0078125, %v1146_v2 }
 0x438   : > { %v1190_v6 = vadd.f32 1e-12, %v1174_v57  ;;  %v1191_v7 = vadd.f32 1e-12, %v1175_v5 }
 0x439   : > { %v1148_v17 = vpop.xlane.xlu1 %1147  ;;  %v1150_v10 = vpop.xlane.xlu0 %1149 }
 0x43a   : > { %1747 = vrsqrt.f32 %v1190_v6  ;;  %v1176_v11 = vmul.f32 0.0078125, %v1148_v17  ;;  %v1177_v12 = vmul.f32 0.0078125, %v1150_v10 }
 0x43b   : > { %1749 = vrsqrt.f32 %v1191_v7 }
 0x43c   : > { %v1192_v13 = vadd.f32 1e-12, %v1176_v11  ;;  %v1193_v14 = vadd.f32 1e-12, %v1177_v12 }
 0x43d   : > { %v1152_v19 = vpop.xlane.xlu1 %1151  ;;  %v1154_v22 = vpop.xlane.xlu0 %1153 }
 0x43e   : > { %1751 = vrsqrt.f32 %v1192_v13  ;;  %v1178_v25 = vmul.f32 0.0078125, %v1152_v19  ;;  %v1179_v28 = vmul.f32 0.0078125, %v1154_v22 }
 0x43f   : > { %1753 = vrsqrt.f32 %v1193_v14 }
 0x440   : > { %v1194_v29 = vadd.f32 1e-12, %v1178_v25  ;;  %v1195_v30 = vadd.f32 1e-12, %v1179_v28 }
 0x441   : > { %v1156_v34 = vpop.xlane.xlu1 %1155  ;;  %v1158_v20 = vpop.xlane.xlu0 %1157 }
 0x442   : > { %1755 = vrsqrt.f32 %v1194_v29  ;;  %v1180_v35 = vmul.f32 0.0078125, %v1156_v34  ;;  %v1181_v23 = vmul.f32 0.0078125, %v1158_v20 }
 0x443   : > { %v1746_v16 = vpop.eup %1745  ;;  %1757 = vrsqrt.f32 %v1195_v30 }
 0x444   : > { %v1221_v39 = vmul.f32 %v1746_v16, %v2531_v62  ;;  %v1196_v26 = vadd.f32 1e-12, %v1180_v35  ;;  %v1197_v40 = vadd.f32 1e-12, %v1181_v23 }
 0x445   : > { %v1160_v4 = vpop.xlane.xlu1 %1159  ;;  %v1162_v27 = vpop.xlane.xlu0 %1161 }
 0x446   : > { %v1244_v44 = vmul.f32 %v2609_v37, %v1221_v39  ;;  %1759 = vrsqrt.f32 %v1196_v26  ;;  %v1182_v24 = vmul.f32 0.0078125, %v1160_v4  ;;  %v1183_v45 = vmul.f32 0.0078125, %v1162_v27 }
 0x447   : > { %v1748_v46 = vpop.eup %1747  ;;  %1761 = vrsqrt.f32 %v1197_v40 }
 0x448   : > { %v1750_v36 = vpop.eup %1749  ;;  %v1267_v62 = vadd.f32 %v2615_v41, %v1244_v44  ;;  %v1222_v48 = vmul.f32 %v1748_v46, %v2537_v8  ;;  %v1198_v47 = vadd.f32 1e-12, %v1182_v24  ;;  %v1199_v1 = vadd.f32 1e-12, %v1183_v45 }
 0x449   : > { %v1223_v50 = vmul.f32 %v1750_v36, %v2533_v63  ;;  %v1164_v51 = vpop.xlane.xlu1 %1163  ;;  %v1166_v52 = vpop.xlane.xlu0 %1165 }
 0x44a   : > { %1283 = vst [vmem:[%s2228_s23] sm:$0xff] %v1267_v62  ;;  %v1245_v42 = vmul.f32 %v2609_v37, %v1222_v48  ;;  %1763 = vrsqrt.f32 %v1198_v47  ;;  %v1184_v54 = vmul.f32 0.0078125, %v1164_v51  ;;  %v1185_v58 = vmul.f32 0.0078125, %v1166_v52 }
 0x44b   : > { %v1752_v59 = vpop.eup %1751  ;;  %v1246_v60 = vmul.f32 %v2609_v37, %v1223_v50  ;;  %1765 = vrsqrt.f32 %v1199_v1 }
 0x44c   : > { %v1754_v55 = vpop.eup %1753  ;;  %v1268_v8 = vadd.f32 %v2615_v41, %v1245_v42  ;;  %v1224_v61 = vmul.f32 %v1752_v59, %v2539_v9  ;;  %v1200_v63 = vadd.f32 1e-12, %v1184_v54  ;;  %v1201_v0 = vadd.f32 1e-12, %v1185_v58 }
 0x44d   : > { %v1269_v2 = vadd.f32 %v2615_v41, %v1246_v60  ;;  %v1225_v57 = vmul.f32 %v1754_v55, %v2545_v15  ;;  %v1168_v5 = vpop.xlane.xlu1 %1167  ;;  %v1170_v6 = vpop.xlane.xlu0 %1169 }
 0x44e   : > { %1284 = vst [vmem:[%s2228_s23 + $0x8] sm:$0xff] %v1268_v8  ;;  %v1247_v7 = vmul.f32 %v2609_v37, %v1224_v61  ;;  %1767 = vrsqrt.f32 %v1200_v63  ;;  %v1186_v17 = vmul.f32 0.0078125, %v1168_v5  ;;  %v1187_v10 = vmul.f32 0.0078125, %v1170_v6 }
 0x44f   : > { %v1756_v11 = vpop.eup %1755  ;;  %1285 = vst [vmem:[%s2228_s23 + $0x10] sm:$0xff] %v1269_v2  ;;  %v1248_v9 = vmul.f32 %v2609_v37, %v1225_v57  ;;  %1769 = vrsqrt.f32 %v1201_v0 }
 0x450   : > { %v1758_v12 = vpop.eup %1757  ;;  %v1270_v13 = vadd.f32 %v2615_v41, %v1247_v7  ;;  %v1226_v15 = vmul.f32 %v1756_v11, %v2548_v18  ;;  %v1202_v14 = vadd.f32 1e-12, %v1186_v17  ;;  %v1203_v19 = vadd.f32 1e-12, %v1187_v10 }
 0x451   : > { %v1271_v22 = vadd.f32 %v2615_v41, %v1248_v9  ;;  %v1227_v25 = vmul.f32 %v1758_v12, %v2555_v32  ;;  %v1172_v28 = vpop.xlane.xlu1 %1171 }
 0x452   : > { %1286 = vst [vmem:[%s2228_s23 + $0x18] sm:$0xff] %v1270_v13  ;;  %v1249_v29 = vmul.f32 %v2609_v37, %v1226_v15  ;;  %1771 = vrsqrt.f32 %v1202_v14  ;;  %v1188_v30 = vmul.f32 0.0078125, %v1172_v28 }
 0x453   : > { %v1760_v34 = vpop.eup %1759  ;;  %1287 = vst [vmem:[%s2228_s23 + $0x20] sm:$0xff] %v1271_v22  ;;  %v1250_v20 = vmul.f32 %v2609_v37, %v1227_v25  ;;  %1773 = vrsqrt.f32 %v1203_v19 }
 0x454   : > { %v1762_v18 = vpop.eup %1761  ;;  %v1272_v35 = vadd.f32 %v2615_v41, %v1249_v29  ;;  %v1228_v23 = vmul.f32 %v1760_v34, %v2558_v33  ;;  %v1204_v32 = vadd.f32 1e-12, %v1188_v30 }
 0x455   : > { %v1273_v16 = vadd.f32 %v2615_v41, %v1250_v20  ;;  %v1229_v39 = vmul.f32 %v1762_v18, %v2565_v21 }
 0x456   : > { %1288 = vst [vmem:[%s2228_s23 + $0x28] sm:$0xff] %v1272_v35  ;;  %v1251_v26 = vmul.f32 %v2609_v37, %v1228_v23  ;;  %1775 = vrsqrt.f32 %v1204_v32 }
 0x457   : > { %v1764_v40 = vpop.eup %1763  ;;  %1289 = vst [vmem:[%s2228_s23 + $0x30] sm:$0xff] %v1273_v16  ;;  %v1252_v4 = vmul.f32 %v2609_v37, %v1229_v39 }
 0x458   : > { %v1766_v27 = vpop.eup %1765  ;;  %v1274_v44 = vadd.f32 %v2615_v41, %v1251_v26  ;;  %v1230_v33 = vmul.f32 %v1764_v40, %v2568_v38 }
 0x459   : > { %v1275_v24 = vadd.f32 %v2615_v41, %v1252_v4  ;;  %v1231_v45 = vmul.f32 %v1766_v27, %v2575_v3 }
 0x45a   : > { %1290 = vst [vmem:[%s2228_s23 + $0x38] sm:$0xff] %v1274_v44  ;;  %v1253_v21 = vmul.f32 %v2609_v37, %v1230_v33 }
 0x45b   : > { %v1768_v46 = vpop.eup %1767  ;;  %1291 = vst [vmem:[%s2228_s23 + $0x40] sm:$0xff] %v1275_v24  ;;  %v1254_v36 = vmul.f32 %v2609_v37, %v1231_v45 }
 0x45c   : > { %v1770_v62 = vpop.eup %1769  ;;  %v1276_v48 = vadd.f32 %v2615_v41, %v1253_v21  ;;  %v1232_v47 = vmul.f32 %v1768_v46, %v2578_v43 }
 0x45d   : > { %v1277_v38 = vadd.f32 %v2615_v41, %v1254_v36  ;;  %v1233_v1 = vmul.f32 %v1770_v62, %v2585_v31 }
 0x45e   : > { %1292 = vst [vmem:[%s2228_s23 + $0x48] sm:$0xff] %v1276_v48  ;;  %v1255_v3 = vmul.f32 %v2609_v37, %v1232_v47 }
 0x45f   : > { %v1772_v50 = vpop.eup %1771  ;;  %1293 = vst [vmem:[%s2228_s23 + $0x50] sm:$0xff] %v1277_v38  ;;  %v1256_v51 = vmul.f32 %v2609_v37, %v1233_v1 }
 0x460   : > { %v1774_v52 = vpop.eup %1773  ;;  %v1278_v42 = vadd.f32 %v2615_v41, %v1255_v3  ;;  %v1234_v43 = vmul.f32 %v1772_v50, %v2588_v49 }
 0x461   : > { %v1279_v54 = vadd.f32 %v2615_v41, %v1256_v51  ;;  %v1235_v31 = vmul.f32 %v1774_v52, %v2595_v56 }
 0x462   : > { %1294 = vst [vmem:[%s2228_s23 + $0x58] sm:$0xff] %v1278_v42  ;;  %v1257_v58 = vmul.f32 %v2609_v37, %v1234_v43 }
 0x463   : > { %v1776_v59 = vpop.eup %1775  ;;  %1295 = vst [vmem:[%s2228_s23 + $0x60] sm:$0xff] %v1279_v54  ;;  %v1258_v60 = vmul.f32 %v2609_v37, %v1235_v31 }
 0x464   : > { %v1280_v55 = vadd.f32 %v2615_v41, %v1257_v58  ;;  %v1236_v8 = vmul.f32 %v1776_v59, %v2598_v53 }
 0x465   : > { %v1281_v49 = vadd.f32 %v2615_v41, %v1258_v60 }
 0x466   : > { %1296 = vst [vmem:[%s2228_s23 + $0x68] sm:$0xff] %v1280_v55  ;;  %v1259_v56 = vmul.f32 %v2609_v37, %v1236_v8 }
 0x467   : > { %1297 = vst [vmem:[%s2228_s23 + $0x70] sm:$0xff] %v1281_v49 }
 0x468   : > { %v1282_v53 = vadd.f32 %v2615_v41, %v1259_v56 }
 0x46a   : > { %1298 = vst [vmem:[%s2228_s23 + $0x78] sm:$0xff] %v1282_v53 }
 0x46b   : > { %1922 = shalt.err (!%p1919_p11)
}
 0x46c   : > { %s1923_s23 = scalar_lea.hbm %s2683_s20, 2048  ;;  %s1927_s19 = scalar_lea.hbm %s2737_s7, 4096 }
 0x46d   : > { %p1924_p8 = scmp.ne.s32.totalorder %s2683_s20, %s1923_s23  ;;  %p1928_p9 = scmp.lt.s32.totalorder %s2683_s20, %s2737_s7 }
 0x46e   : > { %p1929_p5 = scmp.lt.s32.totalorder %s1927_s19, %s1923_s23 }
 0x46f   : > { %p1925_p3 = pnand %p1924_p8, %p2782_p2 }
 0x470   : > { %p1930_p12 = por %p1929_p5, %p1928_p9 }
 0x471   : > { %p1926_p4 = pneg %p1925_p3 }
 0x473   : > { %p1931_p1 = pnand %p1930_p12, %p1926_p4 }
 0x475   : > { %1934 = shalt.err (!%p1931_p1)
}
 0x476   : > { %s2044_s30 = smov 128   ;;  %s2045_s10 = smov 8  }
 0x477   : > { %1631 = dma.vmem_to_hbm [thread:$0]  (%p2782_p2), %s2685_s18, 2048, %s2683_s20, %s1300_s0, %s2044_s30, %s2044_s30, %s2045_s10  }
 0x478 PF: > { %s2783_s25 = sld [smem:[#allocation24_spill]] }
 0x479   : > { %s2784_s16 = sld [smem:[#allocation28_spill]] }
 0x47a   : > { %s2785_s4 = sld [smem:[#allocation27_spill]] }
 0x47e   : > { %s1329_s9 = sand.u32 1, %s2783_s25  }
 0x47f   : > { %p2786_p6 = scmp.ne.s32.totalorder %s2784_s16, 0  ;;  %s1330_s29 = scalar_lea.sflag [#allocation8], %s1329_s9 }
 0x480   : > { %p2787_p13 = scmp.ge.s32.totalorder %s2785_s4, 2 }
 0x482   : > { %p1645_p7 = pnand %p2787_p13, %p2786_p6 }
 0x484   : > { %p1646_p10 = pneg %p1645_p7 }
 0x486   : > { %1988 = dma.done.wait (%p1646_p10), %s1330_s29, 2048  }
 0x487   : > { %1990 = vsyncadd (%p1646_p10), %s1330_s29, 4294965248  ;;  %s2788_s30 = sld [smem:[#allocation29_spill]] }
 0x488   : > { %s2789_s27 = sld [smem:[#allocation25_spill]] }
 0x489   : > { %s2790_s28 = sld [smem:[#allocation26_spill]] }
 0x48a   : > { %s2791_s29 = sld [smem:[#allocation30_spill]] }
 0x48d   : > { %p25_p0 = scmp.ge.s32.totalorder %s2788_s30, 4  }
 0x48f   :  { %27 = sbr.rel (!%p25_p0) target bundleno = 14 (0xe), region = 225 }
 0x494   :  { %1335 = vsyncpa [#allocation7], 1 }
 0x495   :  { %1337 = vsyncpa [#allocation7 + $0x1], 1 }
 0x496   :  { %1338 = vsyncpa [#allocation10], 1 }
 0x497   :  { %1339 = vsyncpa [#allocation8], 1 }
 0x498   :  { %1341 = vsyncpa [#allocation8 + $0x1], 1 }
 0x499   :  { %1342 = vsyncmov [#allocation3] }
 0x49c   :  { %s1343_s12 = vpop.sfrf %1342 }
 0x49d   :  { %p1541_p2 = scmp.ne.s32.totalorder %s1343_s12, 0 }
 0x49f   :  { %1347 = shalt.err (%p1541_p2)  }
 0x4a0   :  { %1349 = vsyncmov [#allocation3 + $0x1] }
 0x4a3   :  { %s1350_s24 = vpop.sfrf %1349 }
 0x4a4   :  { %p1542_p11 = scmp.ne.s32.totalorder %s1350_s24, 0 }
 0x4a6   :  { %1354 = shalt.err (%p1542_p11)  }

</bundles_post_ra>
